<compile_context>
chip_gen: v6e
topology: v6e:2x2x1
jax: 0.10.0
libtpu: 0.0.40
codegen_flags: <defaults>
</compile_context>

<pallas_src>
import functools

import jax
import jax.numpy as jnp
from jax.experimental import pallas as pl
from jax.experimental.pallas import tpu as pltpu


# ----------------------------- Pallas kernel --------------------------------
def _conv_bn_relu_kernel(x_ref, w_ref, s_ref, b_ref, o_ref, col_ref, *,
                         kh_sz, kw_sz, stride, toh, ow):
    """Fused conv(+bias) + folded-BN + ReLU for one (batch, row-tile) block.

    x_ref   : (H_pad, W_pad, Cin)       bf16  -- full padded image, this batch
    w_ref   : (KH*KW*Cin, Cout_pad)     bf16  -- pre-packed im2col weights
    s_ref   : (1, Cout_pad)             f32   -- folded BN scale
    b_ref   : (1, Cout_pad)             f32   -- folded BN (+conv) bias
    o_ref   : (TOH*OW, Cout_pad)        bf16
    col_ref : (TOH*OW, KH*KW*Cin)       bf16  -- VMEM im2col scratch
    """
    cin = x_ref.shape[-1]
    m = toh * ow

    r = pl.program_id(1)
    row0 = pl.multiple_of(r * (toh * stride), toh * stride)
    slab_rows = (toh - 1) * stride + kh_sz

    # One load of the halo'd row slab for this output tile (dynamic only on
    # the leading, non-minor axis -> cheap).
    x_slab = x_ref[pl.ds(row0, slab_rows), :, :]          # (slab, W_pad, Cin)

    row_span = (toh - 1) * stride + 1
    col_span = (ow - 1) * stride + 1

    # Build the (M, KH*KW*Cin) im2col slab in VMEM with one small static-slice
    # store per tap (each tap is stored immediately -> bounded live ranges).
    # TODO(synk): stride > 1 relies on strided in-register slicing; only
    #             stride == 1 is exercised by the test below.  For stride > 1
    #             the striding should move into the load/index_map.
    for kh in range(kh_sz):
        rows = x_slab[kh:kh + row_span:stride]            # (toh, W_pad, Cin)
        for kw in range(kw_sz):
            tap = rows[:, kw:kw + col_span:stride, :]     # (toh, ow, Cin)
            lo = (kh * kw_sz + kw) * cin
            col_ref[:, lo:lo + cin] = tap.reshape(m, cin)

    # Single MXU contraction over K = KH*KW*Cin.
    acc = jnp.dot(col_ref[...], w_ref[...],
                  preferred_element_type=jnp.float32)     # (M, Cpad) f32

    y = acc * s_ref[...] + b_ref[...]                     # f32 epilogue
    o_ref[...] = jnp.maximum(y, 0.0).astype(o_ref.dtype)  # ReLU + bf16 store


# ------------------------------ JAX wrapper ----------------------------------
def basic_conv_forward(x_nchw, params, *, stride=1, padding=0, tile_oh=None):
    """Forward pass of BasicConv. x_nchw: (N, Cin, H, W) float32, output NCHW."""
    w = params["conv_w"]          # (Cout, Cin, KH, KW)
    conv_b = params["conv_b"]     # (Cout,)
    gamma = params["bn_gamma"]    # (Cout,)
    beta = params["bn_beta"]      # (Cout,)
    rmean = params["bn_mean"]     # (Cout,)
    rvar = params["bn_var"]       # (Cout,)
    eps = 1e-5

    Cout, Cin, KH, KW = w.shape
    N, _, H, W = x_nchw.shape
    OH = (H + 2 * padding - KH) // stride + 1
    OW = (W + 2 * padding - KW) // stride + 1
    H_pad, W_pad = H + 2 * padding, W + 2 * padding

    # NCHW -> NHWC (+ spatial zero pad), bf16 for the MXU operand stream.
    # TODO(synk): in a full network keep NHWC end-to-end so these boundary
    #             transposes fuse into the producer/consumer ops.
    x = jnp.transpose(x_nchw, (0, 2, 3, 1))
    if padding:
        x = jnp.pad(x, ((0, 0), (padding, padding), (padding, padding), (0, 0)))
    x = x.astype(jnp.bfloat16)

    # Lane-dense output channels: pad Cout up to a multiple of 128 with zeros.
    LANE = 128
    Cpad = ((Cout + LANE - 1) // LANE) * LANE
    Kfold = KH * KW * Cin

    # (Cout, Cin, KH, KW) -> (KH, KW, Cin, Cout) -> (KH*KW*Cin, Cpad), bf16.
    # K ordering (kh, kw, c) matches the in-kernel im2col column layout.
    w_k = jnp.transpose(w, (2, 3, 1, 0)).reshape(Kfold, Cout)
    w_k = jnp.pad(w_k, ((0, 0), (0, Cpad - Cout))).astype(jnp.bfloat16)

    # Fold eval-mode BN + conv bias into per-channel scale/bias (f32).
    # Padded channels get scale=0, bias=0 -> exact zeros after ReLU.
    bn_scale = gamma / jnp.sqrt(rvar + eps)
    bn_bias = (conv_b - rmean) * bn_scale + beta
    scale2 = jnp.pad(bn_scale, (0, Cpad - Cout)).reshape(1, Cpad).astype(jnp.float32)
    bias2 = jnp.pad(bn_bias, (0, Cpad - Cout)).reshape(1, Cpad).astype(jnp.float32)

    # Output-row tile: divisor of OH, TOH*OW a multiple of 8, M tile <= 2048
    # (bigger blocks amortize per-step overhead; cap keeps v7x VMEM bounded).
    M_CAP = 2048
    if tile_oh is None:
        tile_oh = OH  # legal fallback: block == full dim
        for c in range(OH, 0, -1):
            if OH % c == 0 and (c * OW) % 8 == 0 and c * OW <= M_CAP:
                tile_oh = c
                break
    assert OH % tile_oh == 0, "tile_oh must divide OH"
    M_TILE = tile_oh * OW
    assert tile_oh == OH or M_TILE % 8 == 0, \
        "row tile must give an M tile that is a multiple of 8"
    n_row_tiles = OH // tile_oh

    kernel = functools.partial(
        _conv_bn_relu_kernel,
        kh_sz=KH, kw_sz=KW, stride=stride, toh=tile_oh, ow=OW)

    # VMEM budget from actual buffer sizes (double-buffered pipeline blocks,
    # plus the col scratch and the f32 dot accumulator temp), with headroom.
    img_bytes = H_pad * W_pad * Cin * 2
    w_bytes = Kfold * Cpad * 2
    sb_bytes = 2 * Cpad * 4
    out_bytes = M_TILE * Cpad * 2
    col_bytes = M_TILE * Kfold * 2
    acc_bytes = M_TILE * Cpad * 4
    vmem_need = 2 * (img_bytes + w_bytes + sb_bytes + out_bytes) \
        + col_bytes + 2 * acc_bytes
    vmem_limit = max(16 << 20, min(64 << 20, int(vmem_need * 1.5) + (2 << 20)))

    cost = pl.CostEstimate(
        flops=2 * N * OH * OW * Kfold * Cpad,
        transcendentals=0,
        bytes_accessed=(x.size * 2 + w_k.size * 2
                        + (scale2.size + bias2.size) * 4
                        + N * OH * OW * Cpad * 2))

    out = pl.pallas_call(
        kernel,
        out_shape=jax.ShapeDtypeStruct((N, OH * OW, Cpad), jnp.bfloat16),
        grid=(N, n_row_tiles),
        in_specs=[
            # Whole padded image of one batch element; same block index across
            # all of its row tiles -> DMAed into VMEM once per batch element.
            pl.BlockSpec((None, H_pad, W_pad, Cin), lambda n, r: (n, 0, 0, 0)),
            pl.BlockSpec((Kfold, Cpad), lambda n, r: (0, 0)),
            pl.BlockSpec((1, Cpad), lambda n, r: (0, 0)),
            pl.BlockSpec((1, Cpad), lambda n, r: (0, 0)),
        ],
        out_specs=pl.BlockSpec((None, M_TILE, Cpad), lambda n, r: (n, r, 0)),
        scratch_shapes=[pltpu.VMEM((M_TILE, Kfold), jnp.bfloat16)],
        compiler_params=pltpu.CompilerParams(
            # batch "parallel" (feeds both v7x cores, no image duplication
            # across row tiles), row tiles "arbitrary" (sequential per core,
            # resident image reused).
            dimension_semantics=("parallel", "arbitrary"),
            vmem_limit_bytes=vmem_limit),
        cost_estimate=cost,
    )(x, w_k, scale2, bias2)

    # (N, OH*OW, Cpad) bf16 -> (N, OH, OW, Cout) -> NCHW f32.  Reshape is
    # layout-free; the channel slice / cast fuse with the transpose.
    out = out.reshape(N, OH, OW, Cpad)[..., :Cout]
    return jnp.transpose(out, (0, 3, 1, 2)).astype(jnp.float32)


def make_params(key, in_channels, out_channels, kernel_size):
    """Deterministic parameter init (shapes match BasicConv.__init__)."""
    k1, k2, k3, k4, k5, k6 = jax.random.split(key, 6)
    shape_w = (out_channels, in_channels, kernel_size, kernel_size)
    return {
        "conv_w": 0.1 * jax.random.normal(k1, shape_w, jnp.float32),
        "conv_b": 0.1 * jax.random.normal(k2, (out_channels,), jnp.float32),
        "bn_gamma": 1.0 + 0.1 * jax.random.normal(k3, (out_channels,), jnp.float32),
        "bn_beta": 0.1 * jax.random.normal(k4, (out_channels,), jnp.float32),
        "bn_mean": 0.1 * jax.random.normal(k5, (out_channels,), jnp.float32),
        "bn_var": jnp.abs(jax.random.normal(k6, (out_channels,), jnp.float32)) + 0.5,
    }


# Reference with matching bf16 operands / f32 accumulation (lax conv).
def basic_conv_reference(x_nchw, params, *, stride=1, padding=0):
    eps = 1e-5
    xb = x_nchw.astype(jnp.bfloat16)
    wb = params["conv_w"].astype(jnp.bfloat16)
    y = jax.lax.conv_general_dilated(
        xb, wb, window_strides=(stride, stride),
        padding=[(padding, padding), (padding, padding)],
        dimension_numbers=("NCHW", "OIHW", "NCHW"),
        preferred_element_type=jnp.float32)
    y = y + params["conv_b"][None, :, None, None]
    scale = params["bn_gamma"] / jnp.sqrt(params["bn_var"] + eps)
    y = (y - params["bn_mean"][None, :, None, None]) * scale[None, :, None, None]
    y = y + params["bn_beta"][None, :, None, None]
    return jnp.maximum(y, 0.0)


if __name__ == "__main__":
    key = jax.random.PRNGKey(0)
    kx, kp = jax.random.split(key)

    # Small shapes consistent with BasicConv usage.
    N, Cin, H, W = 2, 4, 16, 16
    Cout, ksize, stride, padding = 8, 3, 1, 1

    x = jax.random.normal(kx, (N, Cin, H, W), jnp.float32)
    params = make_params(kp, Cin, Cout, ksize)
    ref = basic_conv_reference(x, params, stride=stride, padding=padding)

    # Run both the auto-tiled path and an explicit row-tiled path (grid (2,2)).
    for toh in (None, 8):
        fwd = jax.jit(functools.partial(basic_conv_forward,
                                        stride=stride, padding=padding,
                                        tile_oh=toh))
        out = fwd(x, params)
        jax.block_until_ready(out)
        assert out.shape == (N, Cout, H, W)
        # bf16 output store -> allow bf16-rounding-level tolerance.
        max_err = float(jnp.max(jnp.abs(out - ref)))
        assert jnp.allclose(out, ref, atol=2e-2, rtol=2e-2), max_err

    print("KERNEL_OK")
</pallas_src>

<mosaic_0001>
module attributes {stable_mosaic.version = 11 : i64} {
  func.func @_conv_bn_relu_kernel(%arg0: i32, %arg1: i32, %arg2: memref<1x18x18x4xbf16, #tpu.memory_space<vmem>>, %arg3: memref<36x128xbf16, #tpu.memory_space<vmem>>, %arg4: memref<1x128xf32, #tpu.memory_space<vmem>>, %arg5: memref<1x128xf32, #tpu.memory_space<vmem>>, %arg6: memref<1x256x128xbf16, #tpu.memory_space<vmem>>, %arg7: memref<256x36xbf16, #tpu.memory_space<vmem>>) attributes {dimension_semantics = [#tpu.dimension_semantics<parallel>, #tpu.dimension_semantics<arbitrary>], iteration_bounds = array<i64: 2, 1>, scalar_prefetch = 0 : i64, scratch_operands = 1 : i64, tpu.core_type = #tpu.core_type<tc>, window_params = [{transform_indices = @transform_0, window_bounds = array<i64: 1, 18, 18, 4>}, {pipeline_mode = #tpu.pipeline_mode<synchronous>, transform_indices = @transform_1, window_bounds = array<i64: 36, 128>}, {pipeline_mode = #tpu.pipeline_mode<synchronous>, transform_indices = @transform_2, window_bounds = array<i64: 1, 128>}, {pipeline_mode = #tpu.pipeline_mode<synchronous>, transform_indices = @transform_3, window_bounds = array<i64: 1, 128>}, {transform_indices = @transform_4, window_bounds = array<i64: 1, 256, 128>}]} {
    %c16_i32 = arith.constant 16 : i32
    %0 = arith.muli %arg1, %c16_i32 : i32
    %1 = tpu.assume_multiple %0, 16 : i32
    %c0 = arith.constant 0 : index
    %2 = arith.index_cast %1 : i32 to index
    %c0_0 = arith.constant 0 : index
    %c0_1 = arith.constant 0 : index
    %3 = vector.load %arg2[%c0, %2, %c0_0, %c0_1] : memref<1x18x18x4xbf16, #tpu.memory_space<vmem>>, vector<1x18x18x4xbf16>
    %4 = vector.shape_cast %3 : vector<1x18x18x4xbf16> to vector<18x18x4xbf16>
    %5 = vector.extract_strided_slice %4 {offsets = [0, 0, 0], sizes = [16, 18, 4], strides = [1, 1, 1]} : vector<18x18x4xbf16> to vector<16x18x4xbf16>
    %6 = vector.extract_strided_slice %5 {offsets = [0, 0, 0], sizes = [16, 16, 4], strides = [1, 1, 1]} : vector<16x18x4xbf16> to vector<16x16x4xbf16>
    %7 = vector.shape_cast %6 : vector<16x16x4xbf16> to vector<256x4xbf16>
    %c0_2 = arith.constant 0 : index
    %c0_3 = arith.constant 0 : index
    %8 = vector.load %arg7[%c0_2, %c0_3] : memref<256x36xbf16, #tpu.memory_space<vmem>>, vector<256x4xbf16>
    tpu.vector_store %arg7[%c0_2, %c0_3], %7 {strides = array<i32>} : memref<256x36xbf16, #tpu.memory_space<vmem>>, vector<256x4xbf16>,
    %9 = vector.extract_strided_slice %5 {offsets = [0, 1, 0], sizes = [16, 16, 4], strides = [1, 1, 1]} : vector<16x18x4xbf16> to vector<16x16x4xbf16>
    %10 = vector.shape_cast %9 : vector<16x16x4xbf16> to vector<256x4xbf16>
    %c0_4 = arith.constant 0 : index
    %c4 = arith.constant 4 : index
    %11 = vector.load %arg7[%c0_4, %c4] : memref<256x36xbf16, #tpu.memory_space<vmem>>, vector<256x4xbf16>
    tpu.vector_store %arg7[%c0_4, %c4], %10 {strides = array<i32>} : memref<256x36xbf16, #tpu.memory_space<vmem>>, vector<256x4xbf16>,
    %12 = vector.extract_strided_slice %5 {offsets = [0, 2, 0], sizes = [16, 16, 4], strides = [1, 1, 1]} : vector<16x18x4xbf16> to vector<16x16x4xbf16>
    %13 = vector.shape_cast %12 : vector<16x16x4xbf16> to vector<256x4xbf16>
    %c0_5 = arith.constant 0 : index
    %c8 = arith.constant 8 : index
    %14 = vector.load %arg7[%c0_5, %c8] : memref<256x36xbf16, #tpu.memory_space<vmem>>, vector<256x4xbf16>
    tpu.vector_store %arg7[%c0_5, %c8], %13 {strides = array<i32>} : memref<256x36xbf16, #tpu.memory_space<vmem>>, vector<256x4xbf16>,
    %15 = vector.extract_strided_slice %4 {offsets = [1, 0, 0], sizes = [16, 18, 4], strides = [1, 1, 1]} : vector<18x18x4xbf16> to vector<16x18x4xbf16>
    %16 = vector.extract_strided_slice %15 {offsets = [0, 0, 0], sizes = [16, 16, 4], strides = [1, 1, 1]} : vector<16x18x4xbf16> to vector<16x16x4xbf16>
    %17 = vector.shape_cast %16 : vector<16x16x4xbf16> to vector<256x4xbf16>
    %c0_6 = arith.constant 0 : index
    %c12 = arith.constant 12 : index
    %18 = vector.load %arg7[%c0_6, %c12] : memref<256x36xbf16, #tpu.memory_space<vmem>>, vector<256x4xbf16>
    tpu.vector_store %arg7[%c0_6, %c12], %17 {strides = array<i32>} : memref<256x36xbf16, #tpu.memory_space<vmem>>, vector<256x4xbf16>,
    %19 = vector.extract_strided_slice %15 {offsets = [0, 1, 0], sizes = [16, 16, 4], strides = [1, 1, 1]} : vector<16x18x4xbf16> to vector<16x16x4xbf16>
    %20 = vector.shape_cast %19 : vector<16x16x4xbf16> to vector<256x4xbf16>
    %c0_7 = arith.constant 0 : index
    %c16 = arith.constant 16 : index
    %21 = vector.load %arg7[%c0_7, %c16] : memref<256x36xbf16, #tpu.memory_space<vmem>>, vector<256x4xbf16>
    tpu.vector_store %arg7[%c0_7, %c16], %20 {strides = array<i32>} : memref<256x36xbf16, #tpu.memory_space<vmem>>, vector<256x4xbf16>,
    %22 = vector.extract_strided_slice %15 {offsets = [0, 2, 0], sizes = [16, 16, 4], strides = [1, 1, 1]} : vector<16x18x4xbf16> to vector<16x16x4xbf16>
    %23 = vector.shape_cast %22 : vector<16x16x4xbf16> to vector<256x4xbf16>
    %c0_8 = arith.constant 0 : index
    %c20 = arith.constant 20 : index
    %24 = vector.load %arg7[%c0_8, %c20] : memref<256x36xbf16, #tpu.memory_space<vmem>>, vector<256x4xbf16>
    tpu.vector_store %arg7[%c0_8, %c20], %23 {strides = array<i32>} : memref<256x36xbf16, #tpu.memory_space<vmem>>, vector<256x4xbf16>,
    %25 = vector.extract_strided_slice %4 {offsets = [2, 0, 0], sizes = [16, 18, 4], strides = [1, 1, 1]} : vector<18x18x4xbf16> to vector<16x18x4xbf16>
    %26 = vector.extract_strided_slice %25 {offsets = [0, 0, 0], sizes = [16, 16, 4], strides = [1, 1, 1]} : vector<16x18x4xbf16> to vector<16x16x4xbf16>
    %27 = vector.shape_cast %26 : vector<16x16x4xbf16> to vector<256x4xbf16>
    %c0_9 = arith.constant 0 : index
    %c24 = arith.constant 24 : index
    %28 = vector.load %arg7[%c0_9, %c24] : memref<256x36xbf16, #tpu.memory_space<vmem>>, vector<256x4xbf16>
    tpu.vector_store %arg7[%c0_9, %c24], %27 {strides = array<i32>} : memref<256x36xbf16, #tpu.memory_space<vmem>>, vector<256x4xbf16>,
    %29 = vector.extract_strided_slice %25 {offsets = [0, 1, 0], sizes = [16, 16, 4], strides = [1, 1, 1]} : vector<16x18x4xbf16> to vector<16x16x4xbf16>
    %30 = vector.shape_cast %29 : vector<16x16x4xbf16> to vector<256x4xbf16>
    %c0_10 = arith.constant 0 : index
    %c28 = arith.constant 28 : index
    %31 = vector.load %arg7[%c0_10, %c28] : memref<256x36xbf16, #tpu.memory_space<vmem>>, vector<256x4xbf16>
    tpu.vector_store %arg7[%c0_10, %c28], %30 {strides = array<i32>} : memref<256x36xbf16, #tpu.memory_space<vmem>>, vector<256x4xbf16>,
    %32 = vector.extract_strided_slice %25 {offsets = [0, 2, 0], sizes = [16, 16, 4], strides = [1, 1, 1]} : vector<16x18x4xbf16> to vector<16x16x4xbf16>
    %33 = vector.shape_cast %32 : vector<16x16x4xbf16> to vector<256x4xbf16>
    %c0_11 = arith.constant 0 : index
    %c32 = arith.constant 32 : index
    %34 = vector.load %arg7[%c0_11, %c32] : memref<256x36xbf16, #tpu.memory_space<vmem>>, vector<256x4xbf16>
    tpu.vector_store %arg7[%c0_11, %c32], %33 {strides = array<i32>} : memref<256x36xbf16, #tpu.memory_space<vmem>>, vector<256x4xbf16>,
    %c0_12 = arith.constant 0 : index
    %c0_13 = arith.constant 0 : index
    %35 = vector.load %arg7[%c0_12, %c0_13] : memref<256x36xbf16, #tpu.memory_space<vmem>>, vector<256x36xbf16>
    %c0_14 = arith.constant 0 : index
    %c0_15 = arith.constant 0 : index
    %36 = vector.load %arg3[%c0_14, %c0_15] : memref<36x128xbf16, #tpu.memory_space<vmem>>, vector<36x128xbf16>
    %cst = arith.constant dense<0.000000e+00> : vector<256x128xf32>
    %37 = tpu.matmul %35, %36, %cst {dimension_numbers = #tpu.dot_dimension_numbers<[1], [0], [0], [1], [0, 0, 1, 1], [], []>} : vector<256x36xbf16>, vector<36x128xbf16>, vector<256x128xf32> -> vector<256x128xf32>
    %c0_16 = arith.constant 0 : index
    %c0_17 = arith.constant 0 : index
    %38 = vector.load %arg4[%c0_16, %c0_17] : memref<1x128xf32, #tpu.memory_space<vmem>>, vector<1x128xf32>
    %39 = vector.broadcast %38 : vector<1x128xf32> to vector<256x128xf32>
    %40 = arith.mulf %37, %39 : vector<256x128xf32>
    %c0_18 = arith.constant 0 : index
    %c0_19 = arith.constant 0 : index
    %41 = vector.load %arg5[%c0_18, %c0_19] : memref<1x128xf32, #tpu.memory_space<vmem>>, vector<1x128xf32>
    %42 = vector.broadcast %41 : vector<1x128xf32> to vector<256x128xf32>
    %43 = arith.addf %40, %42 : vector<256x128xf32>
    %cst_20 = arith.constant 0.000000e+00 : f32
    %44 = vector.broadcast %cst_20 : f32 to vector<256x128xf32>
    %45 = arith.maximumf %43, %44 : vector<256x128xf32>
    %46 = arith.truncf %45 : vector<256x128xf32> to vector<256x128xbf16>
    %c0_21 = arith.constant 0 : index
    %c0_22 = arith.constant 0 : index
    %c0_23 = arith.constant 0 : index
    %47 = vector.load %arg6[%c0_21, %c0_22, %c0_23] : memref<1x256x128xbf16, #tpu.memory_space<vmem>>, vector<1x256x128xbf16>
    %48 = vector.shape_cast %47 : vector<1x256x128xbf16> to vector<256x128xbf16>
    %49 = vector.shape_cast %46 : vector<256x128xbf16> to vector<1x256x128xbf16>
    tpu.vector_store %arg6[%c0_21, %c0_22, %c0_23], %49 {strides = array<i32>} : memref<1x256x128xbf16, #tpu.memory_space<vmem>>, vector<1x256x128xbf16>,
    return
  }
  func.func @transform_0(%arg0: i32, %arg1: i32) -> (i32, i32, i32, i32) {
    %c0_i32 = arith.constant 0 : i32
    %c0_i32_0 = arith.constant 0 : i32
    %c0_i32_1 = arith.constant 0 : i32
    %c0_i32_2 = arith.constant 0 : i32
    return %arg0, %c0_i32, %c0_i32_0, %c0_i32_1 : i32, i32, i32, i32
  }
  func.func @transform_1(%arg0: i32, %arg1: i32) -> (i32, i32) {
    %c0_i32 = arith.constant 0 : i32
    %c0_i32_0 = arith.constant 0 : i32
    %c0_i32_1 = arith.constant 0 : i32
    return %c0_i32, %c0_i32_0 : i32, i32
  }
  func.func @transform_2(%arg0: i32, %arg1: i32) -> (i32, i32) {
    %c0_i32 = arith.constant 0 : i32
    %c0_i32_0 = arith.constant 0 : i32
    %c0_i32_1 = arith.constant 0 : i32
    return %c0_i32, %c0_i32_0 : i32, i32
  }
  func.func @transform_3(%arg0: i32, %arg1: i32) -> (i32, i32) {
    %c0_i32 = arith.constant 0 : i32
    %c0_i32_0 = arith.constant 0 : i32
    %c0_i32_1 = arith.constant 0 : i32
    return %c0_i32, %c0_i32_0 : i32, i32
  }
  func.func @transform_4(%arg0: i32, %arg1: i32) -> (i32, i32, i32) {
    %c0_i32 = arith.constant 0 : i32
    %c0_i32_0 = arith.constant 0 : i32
    return %arg0, %arg1, %c0_i32 : i32, i32, i32
  }
}

</mosaic_0001>

<bundles_post_ra>
// kernel: basic_conv_forward.1
= control target key start
LH: loop header
LB: loop body
LE: loop exit
PB: predicated region body
PF: predicated region fallthrough
CT: control target
= control target key end

     0   :  { %s3061_s15 = smov 0   ;;  %s3063_s16 = smov 0   ;;  %s4627_s0 = inlined_call_operand.vmem [shape: bf16[2,18,18,4], index: 0, kind: input, shape index: {}]   ;;  %s4628_s1 = inlined_call_operand.vmem [shape: bf16[36,128], index: 1, kind: input, shape index: {}]   ;;  %s4629_s2 = inlined_call_operand.vmem [shape: f32[1,128], index: 2, kind: input, shape index: {}]   ;;  %s4630_s3 = inlined_call_operand.vmem [shape: f32[1,128], index: 3, kind: input, shape index: {}]   ;;  %s4631_s4 = inlined_call_operand.vmem [shape: bf16[2,256,128], index: 4, kind: output, shape index: {}]  }
   0x1   :  { %s3065_s17 = smov 0  }
   0x2 LB: > { %s26_s18 = sadd.s32 1, %s3022_s16  ;;  %p2666_p0 = scmp.ge.s32.totalorder %s3026_s17, 1  ;;  %s3026_s17 = sphi %s3065_s17, %s14_s17   ;;  %s3022_s16 = sphi %s3063_s16, %s4824_s16   ;;  %s3018_s15 = sphi %s3061_s15, %s4823_s15  }
   0x3   : > { %p28_p1 = scmp.ge.s32.totalorder %s26_s18, 2  ;;  %p176_p2 = scmp.lt.s32.totalorder %s3026_s17, 3 }
   0x5   : > { %s4826_s18 = smov (%p28_p1, %s26_s18), 0  ;;  %p177_p3 = pnand %p2666_p0, %p176_p2 }
   0x7   : > { %180 = sbr.rel (%p177_p3) target bundleno = 878 (0x36e), region = 36 }
   0xc   : > { %p206_p4 = scmp.lt.s32.totalorder %s3018_s15, 1  ;;  %vm280_vm0 = vcmask 27648   ;;  %vm313_vm1 = vsmask.f32 3328  ;;  %vm314_vm2 = vsmask.f32 7440 }
   0xd   : > { %vm3134_vm3 = vmor %vm313_vm1, %vm314_vm2  ;;  %v4722_v28 = vmov 0  ;;  %s3028_s23 = smov 4   ;;  %vm877_vm4 = vcmask 1042432   ;;  %vm878_vm5 = vcmask 1046532   ;;  %s3029_s24 = smov 8   ;;  %vm796_vm7 = vcmask 60448  }
   0xe   : > { %s4828_s15 = smov (!%p206_p4, %s3018_s15), 1  ;;  %v4723_v28 = vsel %vm3134_vm3, 4294967295, %v4722_v28  ;;  %vm3553_vm6 = vmor %vm877_vm4, %vm878_vm5  ;;  %s3030_s25 = smov 12   ;;  %vm1088_vm8 = vcmask 93248   ;;  %vm1219_vm9 = vcmask 126048   ;;  %vm2144_vm10 = vcmask 1041408  }
   0xf   : > { %s2952_s19 = smul.u32 216, %s4828_s15  ;;  %4724 = vst [vmem:[#allocation3_spill] sm:$0xff] %v4723_v28  ;;  %s3031_s26 = smov 16   ;;  %vm1372_vm11 = vcmask 158848   ;;  %vm1509_vm12 = vcmask 191648   ;;  %vm1640_vm13 = vcmask 224448  }
  0x10   : > { %s3032_s27 = smov 20   ;;  %s3033_s28 = smov 24   ;;  %vm1793_vm14 = vcmask 257248   ;;  %vm1930_vm15 = vcmask 290048  }
  0x11   : > { %s3085_s22 = scalar_lea.vmem %s4627_s0, %s2952_s19  ;;  %s3034_s29 = smov 28  }
  0x12   : > { %v3088_v0 = vld [vmem:[%s3085_s22 + $0xc] sm:$0xf]  ;;  %v3091_v1 = vld [vmem:[%s3085_s22 + $0x10] sm:$0xf]  ;;  %v3094_v2 = vld [vmem:[%s3085_s22] sm:$0xf] }
  0x13   : > { %v341_v3 = vshrl.u32 %v3088_v0, 16  ;;  %v344_v4 = vshll.u32 %v3088_v0, 16  ;;  %v350_v5 = vshll.u32 %v3091_v1, 16  ;;  %v3100_v6 = vld [vmem:[%s3085_s22 + $0x4] sm:$0xf]  ;;  %v317_v7 = vshrl.u32 %v3094_v2, 16 }
  0x14   : > { %283 = vst.msk [vmem:[#allocation2 + $0x8] sm:$0xf] %vm280_vm0, %v3088_v0  ;;  %281 = vst.msk [vmem:[#allocation2] sm:$0xf] %vm280_vm0, %v3094_v2  ;;  %v320_v8 = vshll.u32 %v3094_v2, 16  ;;  %v326_v9 = vshll.u32 %v3100_v6, 16 }
  0x15   : > { %284 = vst.msk [vmem:[#allocation2 + $0xc] sm:$0xf] %vm280_vm0, %v3091_v1  ;;  %v3112_v10 = vld [vmem:[%s3085_s22 + $0x14] sm:$0x1]  ;;  %v354_v11 = vshrl.u32 %v3091_v1, 16  ;;  %v330_v12 = vshrl.u32 %v3100_v6, 16 }
  0x16   : > { %282 = vst.msk [vmem:[#allocation2 + $0x4] sm:$0xf] %vm280_vm0, %v3100_v6  ;;  %v343_v13 = vrot.slane %v341_v3, 4  ;;  %v346_v14 = vrot.slane %v344_v4, 5  ;;  %v352_v15 = vrot.slane %v350_v5, 5  ;;  %v319_v16 = vrot.slane %v317_v7, 4 }
  0x17   : > { %v3119_v17 = vld [vmem:[%s3085_s22 + $0x8] sm:$0x1]  ;;  %v322_v18 = vrot.slane %v320_v8, 5  ;;  %v328_v19 = vrot.slane %v326_v9, 5  ;;  %v356_v20 = vrot.slane %v354_v11, 4  ;;  %v360_v21 = vshll.u32 %v3112_v10, 16 }
  0x18   : > { %v3123_v22 = vld [vmem:[%s3085_s22 + $0x1c] sm:$0xf]  ;;  %v347_v23 = vor.u32 %v346_v14, %v343_v13  ;;  %v332_v24 = vrot.slane %v330_v12, 4  ;;  %v336_v25 = vshll.u32 %v3119_v17, 16  ;;  %v3127_v26 = vld [vmem:[%s3085_s22 + $0x20] sm:$0x1] }
  0x19   : > { %v374_v27 = vshll.u32 %v3123_v22, 16  ;;  %286 = vst.msk [vmem:[#allocation2 + $0x14] sm:$0xf] %vm280_vm0, %v3123_v22  ;;  %v323_v29 = vor.u32 %v322_v18, %v319_v16  ;;  %v357_v30 = vor.u32 %v356_v20, %v352_v15  ;;  %v362_v31 = vrot.slane %v360_v21, 5  ;;  %v3140_v33 = vld [vmem:[%s3085_s22 + $0x18] sm:$0xf] }
  0x1a   : > { %v378_v32 = vshrl.u32 %v3123_v22, 16  ;;  %v3143_v34 = vld [vmem:[%s3085_s22 + $0x28] sm:$0xf]  ;;  %v348_v35 = vrot.slane %v347_v23, 4  ;;  %v333_v36 = vor.u32 %v332_v24, %v328_v19  ;;  %v338_v37 = vrot.slane %v336_v25, 5  ;;  %s3035_s10 = smov 32  }
  0x1b   : > { %v376_v38 = vrot.slane %v374_v27, 5  ;;  %v3146_v39 = vld [vmem:[%s3085_s22 + $0x2c] sm:$0x1]  ;;  %285 = vst.msk [vmem:[#allocation2 + $0x10] sm:$0xf] %vm280_vm0, %v3140_v33  ;;  %v324_v40 = vrot.slane %v323_v29, 4 }
  0x1c   : > { %288 = vst.msk [vmem:[#allocation2 + $0x1c] sm:$0xf] %vm280_vm0, %v3143_v34  ;;  %v358_v41 = vrot.slane %v357_v30, 4  ;;  %v380_v42 = vrot.slane %v378_v32, 4  ;;  %v384_v43 = vshll.u32 %v3127_v26, 16  ;;  %v3158_v45 = vsel %vm3134_vm3, %v348_v35, %v352_v15  ;;  %s2759_s19 = sshll.u32 %s4828_s15, 7 }
  0x1d   : > { %v3154_v44 = vld [vmem:[%s3085_s22 + $0x24] sm:$0xf]  ;;  %4725 = vst [vmem:[#allocation4_spill] sm:$0xff] %v3158_v45  ;;  %v334_v46 = vrot.slane %v333_v36, 4  ;;  %v365_v47 = vshrl.u32 %v3140_v33, 16  ;;  %v368_v48 = vshll.u32 %v3140_v33, 16  ;;  %704 = vrot.lane.b32.xlu1 %v3158_v45, %s3028_s23  ;;  %v329_v50 = vsel %vm3134_vm3, %v324_v40, %v328_v19 }
  0x1e   : > { %v3163_v49 = vld [vmem:[%s3085_s22 + $0x34] sm:$0xf]  ;;  %287 = vst.msk [vmem:[#allocation2 + $0x18] sm:$0xf] %vm280_vm0, %v3154_v44  ;;  %v3173_v51 = vsel %vm3134_vm3, %v358_v41, %v362_v31  ;;  %v381_v52 = vor.u32 %v380_v42, %v376_v38  ;;  %v386_v53 = vrot.slane %v384_v43, 5  ;;  %700 = vrot.lane.b32.xlu0 %v329_v50, %s3028_s23  ;;  %v398_v58 = vshll.u32 %v3143_v34, 16 }
  0x1f   : > { %4726 = vst [vmem:[#allocation5_spill] sm:$0xff] %v3173_v51  ;;  %v3176_v54 = vld [vmem:[%s3085_s22 + $0x30] sm:$0xf]  ;;  %290 = vst.msk [vmem:[#allocation2 + $0x24] sm:$0xf] %vm280_vm0, %v3163_v49  ;;  %v339_v55 = vsel %vm3134_vm3, %v334_v46, %v338_v37  ;;  %v367_v56 = vrot.slane %v365_v47, 4 }
  0x20   : > { %v370_v57 = vrot.slane %v368_v48, 5  ;;  %v3185_v59 = vld [vmem:[%s3085_s22 + $0x40] sm:$0xf]  ;;  %289 = vst.msk [vmem:[#allocation2 + $0x20] sm:$0xf] %vm280_vm0, %v3176_v54  ;;  %v382_v60 = vrot.slane %v381_v52, 4 }
  0x21   : > { %v402_v61 = vshrl.u32 %v3143_v34, 16  ;;  %v408_v62 = vshll.u32 %v3146_v39, 16  ;;  %v389_v63 = vshrl.u32 %v3154_v44, 16  ;;  %v3193_v3 = vld [vmem:[%s3085_s22 + $0x38] sm:$0x1]  ;;  %v400_v5 = vrot.slane %v398_v58, 5  ;;  %706 = vrot.lane.b32.xlu1 %v3173_v51, %s3028_s23 }
  0x22   : > { %292 = vst.msk [vmem:[#allocation2 + $0x2c] sm:$0xf] %vm280_vm0, %v3185_v59  ;;  %v371_v4 = vor.u32 %v370_v57, %v367_v56  ;;  %v392_v7 = vshll.u32 %v3154_v44, 16  ;;  %v422_v8 = vshll.u32 %v3163_v49, 16  ;;  %v3200_v9 = vld [vmem:[%s3085_s22 + $0x3c] sm:$0xf]  ;;  %v3206_v11 = vsel %vm3134_vm3, %v382_v60, %v386_v53  ;;  %702 = vrot.lane.b32.xlu0 %v339_v55, %s3028_s23 }
  0x23   : > { %4727 = vst [vmem:[#allocation6_spill] sm:$0xff] %v3206_v11  ;;  %v404_v12 = vrot.slane %v402_v61, 4  ;;  %v410_v13 = vrot.slane %v408_v62, 5  ;;  %v391_v14 = vrot.slane %v389_v63, 4  ;;  %v3209_v15 = vld [vmem:[%s3085_s22 + $0x4c] sm:$0xf] }
  0x24   : > { %291 = vst.msk [vmem:[#allocation2 + $0x28] sm:$0xf] %vm280_vm0, %v3200_v9  ;;  %v372_v16 = vrot.slane %v371_v4, 4  ;;  %v394_v18 = vrot.slane %v392_v7, 5  ;;  %v424_v19 = vrot.slane %v422_v8, 5  ;;  %v426_v20 = vshrl.u32 %v3163_v49, 16 }
  0x25   : > { %294 = vst.msk [vmem:[#allocation2 + $0x34] sm:$0xf] %vm280_vm0, %v3209_v15  ;;  %v405_v21 = vor.u32 %v404_v12, %v400_v5  ;;  %v432_v23 = vshll.u32 %v3193_v3, 16  ;;  %v413_v24 = vshrl.u32 %v3176_v54, 16  ;;  %v416_v25 = vshll.u32 %v3176_v54, 16  ;;  %710 = vrot.lane.b32.xlu1 %v3206_v11, %s3028_s23 }
  0x26   : > { %v3221_v27 = vld [vmem:[%s3085_s22 + $0x48] sm:$0xf]  ;;  %v3225_v29 = vsel %vm3134_vm3, %v372_v16, %v376_v38  ;;  %v395_v30 = vor.u32 %v394_v18, %v391_v14  ;;  %v428_v31 = vrot.slane %v426_v20, 4  ;;  %v3228_v32 = vld [vmem:[%s3085_s22 + $0x44] sm:$0x1]  ;;  %v446_v35 = vshll.u32 %v3185_v59, 16 }
  0x27   : > { %4728 = vst [vmem:[#allocation7_spill] sm:$0xff] %v3225_v29  ;;  %v3232_v36 = vld [vmem:[%s3085_s22 + $0x58] sm:$0xf]  ;;  %293 = vst.msk [vmem:[#allocation2 + $0x30] sm:$0xf] %vm280_vm0, %v3221_v27  ;;  %v406_v37 = vrot.slane %v405_v21, 4  ;;  %708 = vrot.lane.b32.xlu0 %v3225_v29, %s3028_s23 }
  0x28   : > { %v434_v40 = vrot.slane %v432_v23, 5  ;;  %v415_v38 = vrot.slane %v413_v24, 4  ;;  %v418_v41 = vrot.slane %v416_v25, 5  ;;  %v3239_v42 = vld [vmem:[%s3085_s22 + $0x54] sm:$0xf]  ;;  %v396_v43 = vrot.slane %v395_v30, 4 }
  0x29   : > { %296 = vst.msk [vmem:[#allocation2 + $0x3c] sm:$0xf] %vm280_vm0, %v3232_v36  ;;  %v429_v46 = vor.u32 %v428_v31, %v424_v19  ;;  %v3245_v47 = vrot.slane %v446_v35, 5  ;;  %v450_v48 = vshrl.u32 %v3185_v59, 16  ;;  %v3249_v50 = vld [vmem:[%s3085_s22 + $0x64] sm:$0xf]  ;;  %v3255_v52 = vsel %vm3134_vm3, %v406_v37, %v410_v13 }
  0x2a   : > { %4729 = vst [vmem:[#allocation8_spill] sm:$0xff] %v3249_v50  ;;  %295 = vst.msk [vmem:[#allocation2 + $0x38] sm:$0xf] %vm280_vm0, %v3239_v42  ;;  %v419_v53 = vor.u32 %v418_v41, %v415_v38  ;;  %v456_v55 = vshll.u32 %v3228_v32, 16  ;;  %v437_v56 = vshrl.u32 %v3200_v9, 16  ;;  %v3269_v60 = vsel %vm3134_vm3, %v396_v43, %v400_v5  ;;  %714 = vrot.lane.b32.xlu1 %v3255_v52, %s3028_s23 }
  0x2b   : > { %4730 = vst [vmem:[#allocation9_spill] sm:$0xff] %v3255_v52  ;;  %v3260_v57 = vld [vmem:[%s3085_s22 + $0x50] sm:$0x1]  ;;  %v3263_v58 = vld [vmem:[%s3085_s22 + $0x60] sm:$0xf]  ;;  %4732 = vst [vmem:[#allocation11_spill] sm:$0xff] %v3269_v60  ;;  %712 = vrot.lane.b32.xlu0 %v3269_v60, %s3028_s23 }
  0x2c   : > { %4731 = vst [vmem:[#allocation10_spill] sm:$0xff] %v3263_v58  ;;  %298 = vst.msk [vmem:[#allocation2 + $0x44] sm:$0xf] %vm280_vm0, %v3249_v50  ;;  %v430_v61 = vrot.slane %v429_v46, 4  ;;  %v452_v62 = vrot.slane %v450_v48, 4  ;;  %v440_v63 = vshll.u32 %v3200_v9, 16 }
  0x2d   : > { %v3273_v4 = vld [vmem:[%s3085_s22 + $0x70] sm:$0xf]  ;;  %297 = vst.msk [vmem:[#allocation2 + $0x40] sm:$0xf] %vm280_vm0, %v3263_v58  ;;  %v420_v7 = vrot.slane %v419_v53, 4  ;;  %v458_v8 = vrot.slane %v456_v55, 5 }
  0x2e   : > { %4733 = vst [vmem:[#allocation12_spill] sm:$0xff] %v3273_v4  ;;  %v439_v12 = vrot.slane %v437_v56, 4  ;;  %v470_v5 = vshll.u32 %v3209_v15, 16  ;;  %300 = vst.msk [vmem:[#allocation2 + $0x4c] sm:$0xf] %vm280_vm0, %v3273_v4  ;;  %v3286_v13 = vsel %vm3134_vm3, %v430_v61, %v434_v40  ;;  %v453_v14 = vor.u32 %v452_v62, %v3245_v47 }
  0x2f   : > { %4734 = vst [vmem:[#allocation13_spill] sm:$0xff] %v3286_v13  ;;  %v442_v16 = vrot.slane %v440_v63, 5  ;;  %v474_v18 = vshrl.u32 %v3209_v15, 16  ;;  %v3291_v20 = vld [vmem:[%s3085_s22 + $0x6c] sm:$0xf]  ;;  %v3298_v23 = vsel %vm3134_vm3, %v420_v7, %v424_v19  ;;  %v480_v25 = vshll.u32 %v3260_v57, 16  ;;  %718 = vrot.lane.b32.xlu1 %v3286_v13, %s3028_s23 }
  0x30   : > { %4735 = vst [vmem:[#allocation14_spill] sm:$0xff] %v3291_v20  ;;  %v3294_v21 = vld [vmem:[%s3085_s22 + $0x7c] sm:$0xf]  ;;  %4736 = vst [vmem:[#allocation15_spill] sm:$0xff] %v3298_v23  ;;  %v472_v24 = vrot.slane %v470_v5, 5  ;;  %v461_v30 = vshrl.u32 %v3221_v27, 16  ;;  %716 = vrot.lane.b32.xlu0 %v3298_v23, %s3028_s23 }
  0x31   : > { %v3303_v31 = vld [vmem:[%s3085_s22 + $0x5c] sm:$0x1]  ;;  %299 = vst.msk [vmem:[#allocation2 + $0x48] sm:$0xf] %vm280_vm0, %v3291_v20  ;;  %302 = vst.msk [vmem:[#allocation2 + $0x54] sm:$0xf] %vm280_vm0, %v3294_v21  ;;  %v443_v37 = vor.u32 %v442_v16, %v439_v12 }
  0x32   : > { %v454_v35 = vrot.slane %v453_v14, 4  ;;  %v476_v40 = vrot.slane %v474_v18, 4  ;;  %v464_v19 = vshll.u32 %v3221_v27, 16  ;;  %v3311_v38 = vld [vmem:[%s3085_s22 + $0x78] sm:$0xf]  ;;  %v482_v41 = vrot.slane %v480_v25, 5 }
  0x33   : > { %4737 = vst [vmem:[#allocation16_spill] sm:$0xff] %v3311_v38  ;;  %v463_v43 = vrot.slane %v461_v30, 4  ;;  %v494_v46 = vshll.u32 %v3232_v36, 16  ;;  %v498_v48 = vshrl.u32 %v3232_v36, 16  ;;  %v3318_v53 = vld [vmem:[%s3085_s22 + $0x88] sm:$0xf] }
  0x34   : > { %301 = vst.msk [vmem:[#allocation2 + $0x50] sm:$0xf] %vm280_vm0, %v3311_v38  ;;  %v3326_v55 = vsel %vm3134_vm3, %v454_v35, %v458_v8  ;;  %v444_v56 = vrot.slane %v443_v37, 4  ;;  %v477_v61 = vor.u32 %v476_v40, %v472_v24  ;;  %v466_v62 = vrot.slane %v464_v19, 5  ;;  %v3329_v63 = vld [vmem:[%s3085_s22 + $0x84] sm:$0xf] }
  0x35   : > { %4738 = vst [vmem:[#allocation17_spill] sm:$0xff] %v3326_v55  ;;  %4739 = vst [vmem:[#allocation18_spill] sm:$0xff] %v3329_v63  ;;  %v496_v7 = vrot.slane %v494_v46, 5  ;;  %v500_v12 = vrot.slane %v498_v48, 4  ;;  %v504_v5 = vshll.u32 %v3303_v31, 16  ;;  %v485_v14 = vshrl.u32 %v3239_v42, 16  ;;  %722 = vrot.lane.b32.xlu1 %v3326_v55, %s3028_s23 }
  0x36   : > { %304 = vst.msk [vmem:[#allocation2 + $0x5c] sm:$0xf] %vm280_vm0, %v3318_v53  ;;  %v3336_v16 = vld [vmem:[%s3085_s22 + $0x94] sm:$0xf]  ;;  %303 = vst.msk [vmem:[#allocation2 + $0x58] sm:$0xf] %vm280_vm0, %v3329_v63  ;;  %v3343_v8 = vsel %vm3134_vm3, %v444_v56, %v3245_v47  ;;  %v467_v25 = vor.u32 %v466_v62, %v463_v43 }
  0x37   : > { %4740 = vst [vmem:[#allocation19_spill] sm:$0xff] %v3336_v16  ;;  %4741 = vst [vmem:[#allocation20_spill] sm:$0xff] %v3343_v8  ;;  %v478_v18 = vrot.slane %v477_v61, 4  ;;  %v488_v30 = vshll.u32 %v3239_v42, 16  ;;  %v3347_v35 = vld [vmem:[%s3085_s22 + $0x68] sm:$0x1]  ;;  %v501_v40 = vor.u32 %v500_v12, %v496_v7  ;;  %720 = vrot.lane.b32.xlu0 %v3343_v8, %s3028_s23 }
  0x38   : > { %v3350_v37 = vld [vmem:[%s3085_s22 + $0x90] sm:$0xf]  ;;  %306 = vst.msk [vmem:[#allocation2 + $0x64] sm:$0xf] %vm280_vm0, %v3336_v16  ;;  %v506_v19 = vrot.slane %v504_v5, 5  ;;  %v487_v46 = vrot.slane %v485_v14, 4 }
  0x39   : > { %v518_v47 = vshll.u32 %v3249_v50, 16  ;;  %v3358_v48 = vld [vmem:[%s3085_s22 + $0xa0] sm:$0xf]  ;;  %305 = vst.msk [vmem:[#allocation2 + $0x60] sm:$0xf] %vm280_vm0, %v3350_v37  ;;  %v3366_v43 = vsel %vm3134_vm3, %v478_v18, %v482_v41  ;;  %v468_v56 = vrot.slane %v467_v25, 4 }
  0x3a   : > { %4742 = vst [vmem:[#allocation21_spill] sm:$0xff] %v3366_v43  ;;  %v490_v61 = vrot.slane %v488_v30, 5  ;;  %v522_v62 = vshrl.u32 %v3249_v50, 16  ;;  %308 = vst.msk [vmem:[#allocation2 + $0x6c] sm:$0xf] %vm280_vm0, %v3358_v48  ;;  %v502_v12 = vrot.slane %v501_v40, 4  ;;  %726 = vrot.lane.b32.xlu1 %v3366_v43, %s3028_s23 }
  0x3b   : > { %v520_v5 = vrot.slane %v518_v47, 5  ;;  %v528_v14 = vshll.u32 %v3347_v35, 16  ;;  %v509_v55 = vshrl.u32 %v3263_v58, 16  ;;  %v3374_v8 = vld [vmem:[%s3085_s22 + $0x9c] sm:$0xf]  ;;  %v3378_v41 = vsel %vm3134_vm3, %v468_v56, %v472_v24 }
  0x3c   : > { %4743 = vst [vmem:[#allocation22_spill] sm:$0xff] %v3378_v41  ;;  %v491_v18 = vor.u32 %v490_v61, %v487_v46  ;;  %v524_v25 = vrot.slane %v522_v62, 4  ;;  %v512_v30 = vshll.u32 %v3263_v58, 16  ;;  %v3382_v23 = vld [vmem:[%s3085_s22 + $0x74] sm:$0x1]  ;;  %v3393_v47 = vsel %vm3134_vm3, %v502_v12, %v506_v19  ;;  %724 = vrot.lane.b32.xlu0 %v3378_v41, %s3028_s23 }
  0x3d   : > { %4744 = vst [vmem:[#allocation23_spill] sm:$0xff] %v3382_v23  ;;  %v3385_v40 = vld [vmem:[%s3085_s22 + $0xac] sm:$0xf]  ;;  %307 = vst.msk [vmem:[#allocation2 + $0x68] sm:$0xf] %vm280_vm0, %v3374_v8  ;;  %v530_v24 = vrot.slane %v528_v14, 5 }
  0x3e   : > { %4745 = vst [vmem:[#allocation24_spill] sm:$0xff] %v3393_v47  ;;  %v511_v46 = vrot.slane %v509_v55, 4  ;;  %v542_v56 = vshll.u32 %v3273_v4, 16  ;;  %v3397_v61 = vld [vmem:[%s3085_s22 + $0xa8] sm:$0xf]  ;;  %v492_v62 = vrot.slane %v491_v18, 4  ;;  %v525_v43 = vor.u32 %v524_v25, %v520_v5  ;;  %730 = vrot.lane.b32.xlu1 %v3393_v47, %s3028_s23 }
  0x3f   : > { %4746 = vst [vmem:[#allocation25_spill] sm:$0xff] %v3397_v61  ;;  %310 = vst.msk [vmem:[#allocation2 + $0x74] sm:$0xf] %vm280_vm0, %v3385_v40  ;;  %v514_v13 = vrot.slane %v512_v30, 5  ;;  %v546_v19 = vshrl.u32 %v3273_v4, 16  ;;  %v552_v14 = vshll.u32 %v3382_v23, 16 }
  0x40   : > { %v3405_v12 = vld [vmem:[%s3085_s22 + $0xb8] sm:$0xf]  ;;  %309 = vst.msk [vmem:[#allocation2 + $0x70] sm:$0xf] %vm280_vm0, %v3397_v61  ;;  %v544_v55 = vrot.slane %v542_v56, 5  ;;  %v533_v60 = vshrl.u32 %v3291_v20, 16  ;;  %v3416_v18 = vsel %vm3134_vm3, %v492_v62, %v496_v7 }
  0x41   : > { %v536_v52 = vshll.u32 %v3291_v20, 16  ;;  %312 = vst.msk [vmem:[#allocation2 + $0x7c] sm:$0xf] %vm280_vm0, %v3405_v12  ;;  %4747 = vst [vmem:[#allocation26_spill] sm:$0xff] %v3416_v18  ;;  %v526_v25 = vrot.slane %v525_v43, 4  ;;  %v515_v30 = vor.u32 %v514_v13, %v511_v46  ;;  %v548_v41 = vrot.slane %v546_v19, 4  ;;  %728 = vrot.lane.b32.xlu0 %v3416_v18, %s3028_s23 }
  0x42   : > { %v3419_v29 = vld [vmem:[%s3085_s22 + $0x80] sm:$0x1]  ;;  %v3422_v11 = vld [vmem:[%s3085_s22 + $0xb4] sm:$0xf]  ;;  %v554_v56 = vrot.slane %v552_v14, 5  ;;  %v535_v45 = vrot.slane %v533_v60, 4 }
  0x43   : > { %v538_v51 = vrot.slane %v536_v52, 5  ;;  %v566_v20 = vshll.u32 %v3294_v21, 16  ;;  %311 = vst.msk [vmem:[#allocation2 + $0x78] sm:$0xf] %vm280_vm0, %v3422_v11  ;;  %v3433_v13 = vsel %vm3134_vm3, %v526_v25, %v530_v24  ;;  %v516_v7 = vrot.slane %v515_v30, 4 }
  0x44   : > { %4748 = vst [vmem:[#allocation27_spill] sm:$0xff] %v3433_v13  ;;  %v549_v43 = vor.u32 %v548_v41, %v544_v55  ;;  %v570_v46 = vshrl.u32 %v3294_v21, 16  ;;  %v576_v52 = vshll.u32 %v3419_v29, 16  ;;  %v557_v19 = vshrl.u32 %v3311_v38, 16  ;;  %v3444_v24 = vld [vmem:[%s3085_s22 + $0x8c] sm:$0x1]  ;;  %734 = vrot.lane.b32.xlu1 %v3433_v13, %s3028_s23 }
  0x45   : > { %v539_v62 = vor.u32 %v538_v51, %v535_v45  ;;  %v568_v60 = vrot.slane %v566_v20, 5  ;;  %v3440_v14 = vsel %vm3134_vm3, %v516_v7, %v520_v5  ;;  %v560_v23 = vshll.u32 %v3311_v38, 16  ;;  %4750 = vst [vmem:[#allocation29_spill] sm:$0xff] %v3444_v24 }
  0x46   : > { %4749 = vst [vmem:[#allocation28_spill] sm:$0xff] %v3440_v14  ;;  %v550_v47 = vrot.slane %v549_v43, 4  ;;  %v572_v18 = vrot.slane %v570_v46, 4  ;;  %v578_v45 = vrot.slane %v576_v52, 5  ;;  %v559_v51 = vrot.slane %v557_v19, 4  ;;  %732 = vrot.lane.b32.xlu0 %v3440_v14, %s3028_s23 }
  0x47   : > { %v540_v41 = vrot.slane %v539_v62, 4  ;;  %v590_v20 = vshll.u32 %v3318_v53, 16  ;;  %v562_v30 = vrot.slane %v560_v23, 5  ;;  %v594_v7 = vshrl.u32 %v3318_v53, 16 }
  0x48   : > { %v3453_v5 = vsel %vm3134_vm3, %v550_v47, %v554_v56  ;;  %v573_v25 = vor.u32 %v572_v18, %v568_v60  ;;  %v600_v62 = vshll.u32 %v3444_v24, 16  ;;  %v581_v52 = vshrl.u32 %v3329_v63, 16  ;;  %v3464_v47 = vld [vmem:[%s3085_s22 + $0x98] sm:$0x1]  ;;  %v3484_v24 = vld [vmem:[%s3085_s22 + $0xa4] sm:$0x1] }
  0x49   : > { %4751 = vst [vmem:[#allocation30_spill] sm:$0xff] %v3453_v5  ;;  %v3458_v43 = vsel %vm3134_vm3, %v540_v41, %v544_v55  ;;  %v592_v46 = vrot.slane %v590_v20, 5  ;;  %v563_v13 = vor.u32 %v562_v30, %v559_v51  ;;  %v596_v14 = vrot.slane %v594_v7, 4  ;;  %738 = vrot.lane.b32.xlu1 %v3453_v5, %s3028_s23 }
  0x4a   : > { %4752 = vst [vmem:[#allocation31_spill] sm:$0xff] %v3458_v43  ;;  %v574_v19 = vrot.slane %v573_v25, 4  ;;  %v584_v38 = vshll.u32 %v3329_v63, 16  ;;  %v602_v23 = vrot.slane %v600_v62, 5  ;;  %v583_v18 = vrot.slane %v581_v52, 4  ;;  %736 = vrot.lane.b32.xlu0 %v3458_v43, %s3028_s23 }
  0x4b   : > { %v614_v55 = vshll.u32 %v3336_v16, 16  ;;  %v618_v56 = vshrl.u32 %v3336_v16, 16  ;;  %v564_v51 = vrot.slane %v563_v13, 4  ;;  %v597_v20 = vor.u32 %v596_v14, %v592_v46 }
  0x4c   : > { %v3474_v41 = vsel %vm3134_vm3, %v574_v19, %v578_v45  ;;  %v586_v25 = vrot.slane %v584_v38, 5  ;;  %v624_v62 = vshll.u32 %v3464_v47, 16  ;;  %v605_v52 = vshrl.u32 %v3350_v37, 16 }
  0x4d   : > { %4753 = vst [vmem:[#allocation32_spill] sm:$0xff] %v3474_v41  ;;  %v616_v30 = vrot.slane %v614_v55, 5  ;;  %v620_v7 = vrot.slane %v618_v56, 4  ;;  %v3480_v5 = vsel %vm3134_vm3, %v564_v51, %v568_v60  ;;  %v598_v63 = vrot.slane %v597_v20, 4  ;;  %742 = vrot.lane.b32.xlu1 %v3474_v41, %s3028_s23 }
  0x4e   : > { %4754 = vst [vmem:[#allocation33_spill] sm:$0xff] %v3480_v5  ;;  %v587_v16 = vor.u32 %v586_v25, %v583_v18  ;;  %v608_v43 = vshll.u32 %v3350_v37, 16  ;;  %v626_v13 = vrot.slane %v624_v62, 5  ;;  %v607_v14 = vrot.slane %v605_v52, 4  ;;  %740 = vrot.lane.b32.xlu0 %v3480_v5, %s3028_s23 }
  0x4f   : > { %v621_v38 = vor.u32 %v620_v7, %v616_v30  ;;  %v638_v45 = vshll.u32 %v3358_v48, 16  ;;  %v3493_v60 = vsel %vm3134_vm3, %v598_v63, %v602_v23  ;;  %v642_v55 = vshrl.u32 %v3358_v48, 16 }
  0x50   : > { %4755 = vst [vmem:[#allocation34_spill] sm:$0xff] %v3493_v60  ;;  %v588_v19 = vrot.slane %v587_v16, 4  ;;  %v610_v18 = vrot.slane %v608_v43, 5  ;;  %v648_v20 = vshll.u32 %v3484_v24, 16  ;;  %v629_v25 = vshrl.u32 %v3374_v8, 16 }
  0x51   : > { %v622_v56 = vrot.slane %v621_v38, 4  ;;  %v640_v51 = vrot.slane %v638_v45, 5  ;;  %v644_v52 = vrot.slane %v642_v55, 4  ;;  %v632_v63 = vshll.u32 %v3374_v8, 16  ;;  %v3504_v16 = vld [vmem:[%s3085_s22 + $0xb0] sm:$0x1]  ;;  %746 = vrot.lane.b32.xlu1 %v3493_v60, %s3028_s23 }
  0x52   : > { %v3500_v7 = vsel %vm3134_vm3, %v588_v19, %v592_v46  ;;  %v611_v62 = vor.u32 %v610_v18, %v607_v14  ;;  %v650_v23 = vrot.slane %v648_v20, 5  ;;  %v631_v38 = vrot.slane %v629_v25, 4 }
  0x53   : > { %4756 = vst [vmem:[#allocation35_spill] sm:$0xff] %v3500_v7  ;;  %v3510_v43 = vsel %vm3134_vm3, %v622_v56, %v626_v13  ;;  %v662_v45 = vshll.u32 %v3385_v40, 16  ;;  %744 = vrot.lane.b32.xlu0 %v3500_v7, %s3028_s23  ;;  %v645_v14 = vor.u32 %v644_v52, %v640_v51  ;;  %v634_v19 = vrot.slane %v632_v63, 5  ;;  %v3524_v7 = vld [vmem:[%s3085_s22 + $0xbc] sm:$0x1] }
  0x54   : > { %4757 = vst [vmem:[#allocation36_spill] sm:$0xff] %v3510_v43  ;;  %v612_v46 = vrot.slane %v611_v62, 4  ;;  %v666_v18 = vshrl.u32 %v3385_v40, 16  ;;  %v672_v60 = vshll.u32 %v3504_v16, 16  ;;  %v653_v5 = vshrl.u32 %v3397_v61, 16 }
  0x55   : > { %v664_v55 = vrot.slane %v662_v45, 5  ;;  %v656_v13 = vshll.u32 %v3397_v61, 16  ;;  %v646_v20 = vrot.slane %v645_v14, 4  ;;  %v635_v25 = vor.u32 %v634_v19, %v631_v38  ;;  %750 = vrot.lane.b32.xlu1 %v3510_v43, %s3028_s23 }
  0x56   : > { %v3521_v56 = vsel %vm3134_vm3, %v612_v46, %v616_v30  ;;  %v668_v41 = vrot.slane %v666_v18, 4  ;;  %v674_v62 = vrot.slane %v672_v60, 5  ;;  %v655_v52 = vrot.slane %v653_v5, 4 }
  0x57   : > { %4758 = vst [vmem:[#allocation37_spill] sm:$0xff] %v3521_v56  ;;  %v658_v63 = vrot.slane %v656_v13, 5  ;;  %v686_v45 = vshll.u32 %v3405_v12, 16  ;;  %748 = vrot.lane.b32.xlu0 %v3521_v56, %s3028_s23  ;;  %v3533_v30 = vsel %vm3134_vm3, %v646_v20, %v650_v23  ;;  %v636_v46 = vrot.slane %v635_v25, 4 }
  0x58   : > { %v669_v38 = vor.u32 %v668_v41, %v664_v55  ;;  %v690_v14 = vshrl.u32 %v3405_v12, 16  ;;  %v696_v43 = vshll.u32 %v3524_v7, 16  ;;  %v677_v5 = vshrl.u32 %v3422_v11, 16 }
  0x59   : > { %v659_v19 = vor.u32 %v658_v63, %v655_v52  ;;  %v688_v18 = vrot.slane %v686_v45, 5  ;;  %v3540_v60 = vsel %vm3134_vm3, %v636_v46, %v640_v51  ;;  %v680_v61 = vshll.u32 %v3422_v11, 16  ;;  %754 = vrot.lane.b32.xlu1 %v3533_v30, %s3028_s23 }
  0x5a   : > { %v670_v13 = vrot.slane %v669_v38, 4  ;;  %v692_v56 = vrot.slane %v690_v14, 4  ;;  %v698_v23 = vrot.slane %v696_v43, 5  ;;  %v679_v20 = vrot.slane %v677_v5, 4 }
  0x5b   : > { %v660_v41 = vrot.slane %v659_v19, 4  ;;  %752 = vrot.lane.b32.xlu0 %v3540_v60, %s3028_s23  ;;  %v682_v51 = vrot.slane %v680_v61, 5  ;;  %v4760_v63 = vmov 0  ;;  %v882_v45 = vrot.slane %v3100_v6, 5 }
  0x5c   : > { %v3549_v25 = vsel %vm3134_vm3, %v670_v13, %v674_v62  ;;  %v693_v52 = vor.u32 %v692_v56, %v688_v18  ;;  %v4761_v63 = vsel %vm3553_vm6, 4294967295, %v4760_v63  ;;  %v2670_v46 = vrot.slane %v3094_v2, 9 }
  0x5d   : > { %4759 = vst [vmem:[#allocation38_spill] sm:$0xff] %v3549_v25  ;;  %4762 = vst [vmem:[#allocation39_spill] sm:$0xff] %v4761_v63  ;;  %v3560_v43 = vsel %vm3134_vm3, %v660_v41, %v664_v55  ;;  %v683_v14 = vor.u32 %v682_v51, %v679_v20  ;;  %758 = vrot.lane.b32.xlu1 %v3549_v25, %s3028_s23  ;;  %v885_v61 = vrot.slane %v3119_v17, 5  ;;  %v884_v62 = vrot.slane %v882_v45, 4  ;;  %v4780_v25 = vld [vmem:[#allocation25_spill] sm:$0xff] }
  0x5e   : > { %4763 = vst [vmem:[#allocation40_spill] sm:$0xff] %v3560_v43  ;;  %v694_v38 = vrot.slane %v693_v52, 4  ;;  %v883_v56 = vsel %vm3553_vm6, %v2670_v46, %v882_v45  ;;  %v889_v2 = vrot.slane %v3091_v1, 5  ;;  %v892_v13 = vrot.slane %v3112_v10, 5 }
  0x5f   : > { %756 = vrot.lane.b32.xlu0 %v3560_v43, %s3028_s23  ;;  %v684_v55 = vrot.slane %v683_v14, 4  ;;  %v886_v17 = vsel %vm3553_vm6, %v884_v62, %v885_v61  ;;  %v896_v41 = vrot.slane %v3123_v22, 5  ;;  %v899_v52 = vrot.slane %v3127_v26, 5 }
  0x60   : > { %v3572_v6 = vsel %vm3134_vm3, %v694_v38, %v698_v23  ;;  %v891_v5 = vrot.slane %v889_v2, 4  ;;  %v2671_v23 = vrot.slane %v3088_v0, 9  ;;  %v903_v51 = vrot.slane %v3143_v34, 5 }
  0x61   : > { %4764 = vst [vmem:[#allocation41_spill] sm:$0xff] %v3572_v6  ;;  %v3577_v19 = vsel %vm3134_vm3, %v684_v55, %v688_v18  ;;  %762 = vrot.lane.b32.xlu1 %v3572_v6, %s3028_s23  ;;  %v898_v20 = vrot.slane %v896_v41, 4  ;;  %v2672_v45 = vrot.slane %v3140_v33, 9  ;;  %v906_v26 = vrot.slane %v3146_v39, 5 }
  0x62   : > { %4765 = vst [vmem:[#allocation42_spill] sm:$0xff] %v3577_v19  ;;  %v3592_v18 = vsel %vm3553_vm6, %v891_v5, %v892_v13  ;;  %v3598_v10 = vsel %vm3553_vm6, %v2671_v23, %v889_v2  ;;  %v905_v38 = vrot.slane %v903_v51, 4  ;;  %v910_v14 = vrot.slane %v3163_v49, 5 }
  0x63   : > { %760 = vrot.lane.b32.xlu0 %v3577_v19, %s3028_s23  ;;  %v3607_v46 = vsel %vm3553_vm6, %v898_v20, %v899_v52  ;;  %v3613_v61 = vsel %vm3553_vm6, %v2672_v45, %v896_v41  ;;  %v913_v39 = vrot.slane %v3193_v3, 5  ;;  %v917_v2 = vrot.slane %v3185_v59, 5 }
  0x64   : > { %v3622_v55 = vsel %vm3553_vm6, %v905_v38, %v906_v26  ;;  %v912_v62 = vrot.slane %v910_v14, 4  ;;  %v2674_v5 = vrot.slane %v3176_v54, 9  ;;  %v920_v3 = vrot.slane %v3228_v32, 5 }
  0x65   : > { %994 = vrot.lane.b32.xlu1 %v886_v17, %s3029_s24  ;;  %v919_v41 = vrot.slane %v917_v2, 4  ;;  %v924_v23 = vrot.slane %v3209_v15, 5  ;;  %v2675_v52 = vrot.slane %v3200_v9, 9  ;;  %v927_v32 = vrot.slane %v3260_v57, 5 }
  0x66   : > { %v3637_v13 = vsel %vm3553_vm6, %v912_v62, %v913_v39  ;;  %v3643_v20 = vsel %vm3553_vm6, %v2674_v5, %v910_v14  ;;  %v931_v38 = vrot.slane %v3232_v36, 5  ;;  %v2676_v14 = vrot.slane %v3221_v27, 9 }
  0x67   : > { %992 = vrot.lane.b32.xlu0 %v883_v56, %s3029_s24  ;;  %v2673_v56 = vrot.slane %v3154_v44, 9  ;;  %v926_v45 = vrot.slane %v924_v23, 4  ;;  %v3658_v26 = vsel %vm3553_vm6, %v2675_v52, %v917_v2  ;;  %v934_v57 = vrot.slane %v3303_v31, 5 }
  0x68   : > { %4767 = vst [vmem:[#allocation44_spill] sm:$0xff] %v3658_v26  ;;  %v933_v62 = vrot.slane %v931_v38, 4  ;;  %v938_v39 = vrot.slane %v3249_v50, 5  ;;  %v3673_v2 = vsel %vm3553_vm6, %v2676_v14, %v924_v23  ;;  %v2677_v5 = vrot.slane %v3239_v42, 9 }
  0x69   : > { %998 = vrot.lane.b32.xlu1 %v3592_v18, %s3029_s24  ;;  %v3628_v17 = vsel %vm3553_vm6, %v2673_v56, %v903_v51  ;;  %v3652_v51 = vsel %vm3553_vm6, %v919_v41, %v920_v3  ;;  %v3667_v56 = vsel %vm3553_vm6, %v926_v45, %v927_v32  ;;  %4769 = vst [vmem:[#allocation46_spill] sm:$0xff] %v3673_v2  ;;  %v941_v31 = vrot.slane %v3347_v35, 5  ;;  %v4773_v35 = vld [vmem:[#allocation23_spill] sm:$0xff] }
  0x6a   : > { %4766 = vst [vmem:[#allocation43_spill] sm:$0xff] %v3652_v51  ;;  %4768 = vst [vmem:[#allocation45_spill] sm:$0xff] %v3667_v56  ;;  %v3682_v41 = vsel %vm3553_vm6, %v933_v62, %v934_v57  ;;  %v940_v3 = vrot.slane %v938_v39, 4  ;;  %v945_v52 = vrot.slane %v3273_v4, 5  ;;  %v3688_v23 = vsel %vm3553_vm6, %v2677_v5, %v931_v38  ;;  %v4775_v5 = vld [vmem:[#allocation14_spill] sm:$0xff] }
  0x6b   : > { %996 = vrot.lane.b32.xlu0 %v3598_v10, %s3029_s24  ;;  %4770 = vst [vmem:[#allocation47_spill] sm:$0xff] %v3682_v41  ;;  %4771 = vst [vmem:[#allocation48_spill] sm:$0xff] %v3688_v23  ;;  %v2678_v45 = vrot.slane %v3263_v58, 9  ;;  %v948_v62 = vrot.slane %v4773_v35, 5  ;;  %v952_v57 = vrot.slane %v3294_v21, 5  ;;  %v2679_v28 = vrot.slane %v4775_v5, 9 }
  0x6c   : > { %v3697_v32 = vsel %vm3553_vm6, %v940_v3, %v941_v31  ;;  %v947_v14 = vrot.slane %v945_v52, 4  ;;  %v955_v35 = vrot.slane %v3419_v29, 5  ;;  %v4777_v29 = vld [vmem:[#allocation29_spill] sm:$0xff]  ;;  %v987_v43 = vrot.slane %v3405_v12, 5 }
  0x6d   : > { %1002 = vrot.lane.b32.xlu1 %v3607_v46, %s3029_s24  ;;  %4772 = vst [vmem:[#allocation49_spill] sm:$0xff] %v3697_v32  ;;  %v3703_v38 = vsel %vm3553_vm6, %v2678_v45, %v938_v39  ;;  %v954_v31 = vrot.slane %v952_v57, 4  ;;  %v3718_v39 = vsel %vm3553_vm6, %v2679_v28, %v945_v52  ;;  %v4776_v45 = vld [vmem:[#allocation16_spill] sm:$0xff]  ;;  %v4779_v52 = vld [vmem:[#allocation18_spill] sm:$0xff]  ;;  %vm2095_vm0 = vcmask 293888  }
  0x6e   : > { %4774 = vst [vmem:[#allocation23_spill] sm:$0xff] %v3703_v38  ;;  %v3712_v3 = vsel %vm3553_vm6, %v947_v14, %v948_v62  ;;  %v2681_v6 = vrot.slane %v4779_v52, 9 }
  0x6f   : > { %1000 = vrot.lane.b32.xlu0 %v3613_v61, %s3029_s24  ;;  %v3727_v14 = vsel %vm3553_vm6, %v954_v31, %v955_v35 }
  0x71   : > { %1006 = vrot.lane.b32.xlu1 %v3622_v55, %s3029_s24 }
  0x73   : > { %1004 = vrot.lane.b32.xlu0 %v3628_v17, %s3029_s24 }
  0x75   : > { %1010 = vrot.lane.b32.xlu1 %v3637_v13, %s3029_s24 }
  0x77   : > { %1008 = vrot.lane.b32.xlu0 %v3643_v20, %s3029_s24 }
  0x79   : > { %1014 = vrot.lane.b32.xlu1 %v3652_v51, %s3029_s24 }
  0x7b   : > { %1012 = vrot.lane.b32.xlu0 %v3658_v26, %s3029_s24  ;;  %v2684_v26 = vrot.slane %v4780_v25, 9 }
  0x7d   : > { %1018 = vrot.lane.b32.xlu1 %v3667_v56, %s3029_s24  ;;  %v980_v56 = vrot.slane %v3385_v40, 5 }
  0x7f   : > { %1016 = vrot.lane.b32.xlu0 %v3673_v2, %s3029_s24  ;;  %v973_v2 = vrot.slane %v3358_v48, 5 }
  0x81   : > { %1022 = vrot.lane.b32.xlu1 %v3682_v41, %s3029_s24  ;;  %v2680_v41 = vrot.slane %v4776_v45, 9 }
  0x83   : > { %1020 = vrot.lane.b32.xlu0 %v3688_v23, %s3029_s24  ;;  %v959_v23 = vrot.slane %v3318_v53, 5  ;;  %v3733_v28 = vsel %vm3553_vm6, %v2680_v41, %v952_v57  ;;  %v2682_v57 = vrot.slane %v3350_v37, 9 }
  0x85   : > { %1026 = vrot.lane.b32.xlu1 %v3697_v32, %s3029_s24  ;;  %v961_v62 = vrot.slane %v959_v23, 4  ;;  %v4778_v32 = vld [vmem:[#allocation19_spill] sm:$0xff]  ;;  %v3748_v41 = vsel %vm3553_vm6, %v2681_v6, %v959_v23  ;;  %v2683_v23 = vrot.slane %v3374_v8, 9 }
  0x86   : > { %v966_v19 = vrot.slane %v4778_v32, 5 }
  0x87   : > { %1024 = vrot.lane.b32.xlu0 %v3703_v38, %s3029_s24  ;;  %v962_v38 = vrot.slane %v4777_v29, 5  ;;  %v969_v29 = vrot.slane %v3464_v47, 5  ;;  %v976_v47 = vrot.slane %v3484_v24, 5  ;;  %v982_v24 = vrot.slane %v980_v56, 4 }
  0x88   : > { %v968_v35 = vrot.slane %v966_v19, 4  ;;  %v3763_v6 = vsel %vm3553_vm6, %v2682_v57, %v966_v19  ;;  %v3778_v57 = vsel %vm3553_vm6, %v2683_v23, %v973_v2  ;;  %v3794_v23 = vsel %vm3553_vm6, %v2684_v26, %v980_v56 }
  0x89   : > { %1030 = vrot.lane.b32.xlu1 %v3712_v3, %s3029_s24  ;;  %v3742_v31 = vsel %vm3553_vm6, %v961_v62, %v962_v38  ;;  %v975_v62 = vrot.slane %v973_v2, 4  ;;  %v990_v2 = vrot.slane %v3524_v7, 5 }
  0x8a   : > { %v3757_v38 = vsel %vm3553_vm6, %v968_v35, %v969_v29  ;;  %v983_v29 = vrot.slane %v3504_v16, 5 }
  0x8b   : > { %1028 = vrot.lane.b32.xlu0 %v3718_v39, %s3029_s24  ;;  %v3772_v35 = vsel %vm3553_vm6, %v975_v62, %v976_v47  ;;  %v989_v62 = vrot.slane %v987_v43, 4 }
  0x8c   : > { %v3789_v16 = vsel %vm3553_vm6, %v982_v24, %v983_v29 }
  0x8d   : > { %1034 = vrot.lane.b32.xlu1 %v3727_v14, %s3029_s24  ;;  %v3805_v7 = vsel %vm3553_vm6, %v989_v62, %v990_v2 }
  0x8f   : > { %1032 = vrot.lane.b32.xlu0 %v3733_v28, %s3029_s24  ;;  %v705_v19 = vpop.permute.xlu1 %704 }
  0x90   : > { %799 = vst.msk [vmem:[#allocation2 + $0x8] sm:$0xf] %vm796_vm7, %v705_v19  ;;  %v701_v51 = vpop.permute.xlu0 %700 }
  0x91   : > { %1038 = vrot.lane.b32.xlu1 %v3742_v31, %s3029_s24  ;;  %797 = vst.msk [vmem:[#allocation2] sm:$0xf] %vm796_vm7, %v701_v51  ;;  %v2685_v51 = vrot.slane %v3422_v11, 9 }
  0x93   : > { %1036 = vrot.lane.b32.xlu0 %v3748_v41, %s3029_s24  ;;  %v707_v47 = vpop.permute.xlu1 %706  ;;  %v3809_v26 = vsel %vm3553_vm6, %v2685_v51, %v987_v43 }
  0x94   : > { %800 = vst.msk [vmem:[#allocation2 + $0xc] sm:$0xf] %vm796_vm7, %v707_v47  ;;  %v703_v19 = vpop.permute.xlu0 %702 }
  0x95   : > { %1042 = vrot.lane.b32.xlu1 %v3757_v38, %s3029_s24  ;;  %798 = vst.msk [vmem:[#allocation2 + $0x4] sm:$0xf] %vm796_vm7, %v703_v19 }
  0x97   : > { %1040 = vrot.lane.b32.xlu0 %v3763_v6, %s3029_s24  ;;  %v711_v24 = vpop.permute.xlu1 %710 }
  0x98   : > { %802 = vst.msk [vmem:[#allocation2 + $0x14] sm:$0xf] %vm796_vm7, %v711_v24 }
  0x99   : > { %1046 = vrot.lane.b32.xlu1 %v3772_v35, %s3029_s24  ;;  %v709_v56 = vpop.permute.xlu0 %708 }
  0x9a   : > { %801 = vst.msk [vmem:[#allocation2 + $0x10] sm:$0xf] %vm796_vm7, %v709_v56 }
  0x9b   : > { %1044 = vrot.lane.b32.xlu0 %v3778_v57, %s3029_s24 }
  0x9c   : > { %v715_v29 = vpop.permute.xlu1 %714 }
  0x9d   : > { %1050 = vrot.lane.b32.xlu1 %v3789_v16, %s3029_s24  ;;  %804 = vst.msk [vmem:[#allocation2 + $0x1c] sm:$0xf] %vm796_vm7, %v715_v29  ;;  %v713_v62 = vpop.permute.xlu0 %712 }
  0x9e   : > { %803 = vst.msk [vmem:[#allocation2 + $0x18] sm:$0xf] %vm796_vm7, %v713_v62 }
  0x9f   : > { %1048 = vrot.lane.b32.xlu0 %v3794_v23, %s3029_s24 }
  0xa1   : > { %1054 = vrot.lane.b32.xlu1 %v3805_v7, %s3029_s24  ;;  %v719_v43 = vpop.permute.xlu1 %718 }
  0xa2   : > { %806 = vst.msk [vmem:[#allocation2 + $0x24] sm:$0xf] %vm796_vm7, %v719_v43  ;;  %v717_v2 = vpop.permute.xlu0 %716 }
  0xa3   : > { %1052 = vrot.lane.b32.xlu0 %v3809_v26, %s3029_s24  ;;  %805 = vst.msk [vmem:[#allocation2 + $0x20] sm:$0xf] %vm796_vm7, %v717_v2 }
  0xa5   : > { %1125 = vrot.lane.b32.xlu1 %v3091_v1, %s3030_s25 }
  0xa7   : > { %1123 = vrot.lane.b32.xlu0 %v3088_v0, %s3030_s25  ;;  %v723_v47 = vpop.permute.xlu1 %722 }
  0xa8   : > { %808 = vst.msk [vmem:[#allocation2 + $0x2c] sm:$0xf] %vm796_vm7, %v723_v47 }
  0xa9   : > { %1129 = vrot.lane.b32.xlu1 %v3123_v22, %s3030_s25  ;;  %v721_v51 = vpop.permute.xlu0 %720 }
  0xaa   : > { %807 = vst.msk [vmem:[#allocation2 + $0x28] sm:$0xf] %vm796_vm7, %v721_v51 }
  0xab   : > { %1127 = vrot.lane.b32.xlu0 %v3140_v33, %s3030_s25 }
  0xac   : > { %v727_v0 = vpop.permute.xlu1 %726 }
  0xad   : > { %1133 = vrot.lane.b32.xlu1 %v3143_v34, %s3030_s25  ;;  %810 = vst.msk [vmem:[#allocation2 + $0x34] sm:$0xf] %vm796_vm7, %v727_v0 }
  0xae   : > { %v725_v1 = vpop.permute.xlu0 %724 }
  0xaf   : > { %1131 = vrot.lane.b32.xlu0 %v3154_v44, %s3030_s25  ;;  %809 = vst.msk [vmem:[#allocation2 + $0x30] sm:$0xf] %vm796_vm7, %v725_v1 }
  0xb0   : > { %v731_v19 = vpop.permute.xlu1 %730 }
  0xb1   : > { %1137 = vrot.lane.b32.xlu1 %v3163_v49, %s3030_s25  ;;  %812 = vst.msk [vmem:[#allocation2 + $0x3c] sm:$0xf] %vm796_vm7, %v731_v19 }
  0xb3   : > { %1135 = vrot.lane.b32.xlu0 %v3176_v54, %s3030_s25  ;;  %v729_v24 = vpop.permute.xlu0 %728 }
  0xb4   : > { %811 = vst.msk [vmem:[#allocation2 + $0x38] sm:$0xf] %vm796_vm7, %v729_v24 }
  0xb5   : > { %1141 = vrot.lane.b32.xlu1 %v3185_v59, %s3030_s25 }
  0xb6   : > { %v735_v56 = vpop.permute.xlu1 %734 }
  0xb7   : > { %1139 = vrot.lane.b32.xlu0 %v3200_v9, %s3030_s25  ;;  %814 = vst.msk [vmem:[#allocation2 + $0x44] sm:$0xf] %vm796_vm7, %v735_v56 }
  0xb8   : > { %v733_v29 = vpop.permute.xlu0 %732 }
  0xb9   : > { %813 = vst.msk [vmem:[#allocation2 + $0x40] sm:$0xf] %vm796_vm7, %v733_v29  ;;  %1145 = vrot.lane.b32.xlu1 %v3209_v15, %s3030_s25 }
  0xbb   : > { %1143 = vrot.lane.b32.xlu0 %v3221_v27, %s3030_s25  ;;  %v739_v62 = vpop.permute.xlu1 %738 }
  0xbc   : > { %816 = vst.msk [vmem:[#allocation2 + $0x4c] sm:$0xf] %vm796_vm7, %v739_v62  ;;  %v737_v43 = vpop.permute.xlu0 %736 }
  0xbd   : > { %815 = vst.msk [vmem:[#allocation2 + $0x48] sm:$0xf] %vm796_vm7, %v737_v43  ;;  %1149 = vrot.lane.b32.xlu1 %v3232_v36, %s3030_s25 }
  0xbf   : > { %1147 = vrot.lane.b32.xlu0 %v3239_v42, %s3030_s25  ;;  %v743_v2 = vpop.permute.xlu1 %742 }
  0xc0   : > { %818 = vst.msk [vmem:[#allocation2 + $0x54] sm:$0xf] %vm796_vm7, %v743_v2  ;;  %v741_v47 = vpop.permute.xlu0 %740 }
  0xc1   : > { %817 = vst.msk [vmem:[#allocation2 + $0x50] sm:$0xf] %vm796_vm7, %v741_v47  ;;  %1153 = vrot.lane.b32.xlu1 %v3249_v50, %s3030_s25  ;;  %v4791_v50 = vld [vmem:[#allocation32_spill] sm:$0xff] }
  0xc3   : > { %1151 = vrot.lane.b32.xlu0 %v3263_v58, %s3030_s25  ;;  %v747_v51 = vpop.permute.xlu1 %746 }
  0xc4   : > { %820 = vst.msk [vmem:[#allocation2 + $0x5c] sm:$0xf] %vm796_vm7, %v747_v51 }
  0xc5   : > { %v745_v0 = vpop.permute.xlu0 %744  ;;  %1157 = vrot.lane.b32.xlu1 %v3273_v4, %s3030_s25  ;;  %v4789_v4 = vld [vmem:[#allocation30_spill] sm:$0xff] }
  0xc6   : > { %819 = vst.msk [vmem:[#allocation2 + $0x58] sm:$0xf] %vm796_vm7, %v745_v0 }
  0xc7   : > { %1155 = vrot.lane.b32.xlu0 %v4775_v5, %s3030_s25  ;;  %v751_v1 = vpop.permute.xlu1 %750 }
  0xc8   : > { %822 = vst.msk [vmem:[#allocation2 + $0x64] sm:$0xf] %vm796_vm7, %v751_v1 }
  0xc9   : > { %v749_v19 = vpop.permute.xlu0 %748  ;;  %1161 = vrot.lane.b32.xlu1 %v3294_v21, %s3030_s25 }
  0xca   : > { %821 = vst.msk [vmem:[#allocation2 + $0x60] sm:$0xf] %vm796_vm7, %v749_v19  ;;  %v3908_v19 = vld [vmem:[%s3085_s22 + $0xc4] sm:$0xf] }
  0xcb   : > { %1159 = vrot.lane.b32.xlu0 %v4776_v45, %s3030_s25  ;;  %v755_v24 = vpop.permute.xlu1 %754 }
  0xcc   : > { %824 = vst.msk [vmem:[#allocation2 + $0x6c] sm:$0xf] %vm796_vm7, %v755_v24 }
  0xcd   : > { %v753_v56 = vpop.permute.xlu0 %752  ;;  %1165 = vrot.lane.b32.xlu1 %v3318_v53, %s3030_s25 }
  0xce   : > { %823 = vst.msk [vmem:[#allocation2 + $0x68] sm:$0xf] %vm796_vm7, %v753_v56  ;;  %v3911_v56 = vld [vmem:[%s3085_s22 + $0xc0] sm:$0xf] }
  0xcf   : > { %1163 = vrot.lane.b32.xlu0 %v4779_v52, %s3030_s25  ;;  %v759_v29 = vpop.permute.xlu1 %758 }
  0xd0   : > { %826 = vst.msk [vmem:[#allocation2 + $0x74] sm:$0xf] %vm796_vm7, %v759_v29 }
  0xd1   : > { %v757_v62 = vpop.permute.xlu0 %756  ;;  %1169 = vrot.lane.b32.xlu1 %v4778_v32, %s3030_s25 }
  0xd2   : > { %825 = vst.msk [vmem:[#allocation2 + $0x70] sm:$0xf] %vm796_vm7, %v757_v62 }
  0xd3   : > { %1167 = vrot.lane.b32.xlu0 %v3350_v37, %s3030_s25  ;;  %v763_v43 = vpop.permute.xlu1 %762 }
  0xd4   : > { %828 = vst.msk [vmem:[#allocation2 + $0x7c] sm:$0xf] %vm796_vm7, %v763_v43 }
  0xd5   : > { %v761_v2 = vpop.permute.xlu0 %760  ;;  %1173 = vrot.lane.b32.xlu1 %v3358_v48, %s3030_s25 }
  0xd6   : > { %827 = vst.msk [vmem:[#allocation2 + $0x78] sm:$0xf] %vm796_vm7, %v761_v2  ;;  %v4781_v2 = vld [vmem:[#allocation5_spill] sm:$0xff] }
  0xd7   : > { %1171 = vrot.lane.b32.xlu0 %v3374_v8, %s3030_s25  ;;  %v995_v47 = vpop.permute.xlu1 %994 }
  0xd8   : > { %1090 = vst.msk [vmem:[#allocation2 + $0x4] sm:$0xf] %vm1088_vm8, %v995_v47  ;;  %v4782_v47 = vld [vmem:[#allocation4_spill] sm:$0xff] }
  0xd9   : > { %v993_v51 = vpop.permute.xlu0 %992  ;;  %1177 = vrot.lane.b32.xlu1 %v3385_v40, %s3030_s25 }
  0xda   : > { %1089 = vst.msk [vmem:[#allocation2] sm:$0xf] %vm1088_vm8, %v993_v51 }
  0xdb   : > { %1175 = vrot.lane.b32.xlu0 %v4780_v25, %s3030_s25  ;;  %v999_v0 = vpop.permute.xlu1 %998 }
  0xdc   : > { %1092 = vst.msk [vmem:[#allocation2 + $0xc] sm:$0xf] %vm1088_vm8, %v999_v0 }
  0xdd   : > { %v997_v1 = vpop.permute.xlu0 %996  ;;  %1181 = vrot.lane.b32.xlu1 %v3405_v12, %s3030_s25 }
  0xde   : > { %1091 = vst.msk [vmem:[#allocation2 + $0x8] sm:$0xf] %vm1088_vm8, %v997_v1  ;;  %v4783_v1 = vld [vmem:[#allocation6_spill] sm:$0xff] }
  0xdf   : > { %1179 = vrot.lane.b32.xlu0 %v3422_v11, %s3030_s25  ;;  %v1003_v24 = vpop.permute.xlu1 %1002 }
  0xe0   : > { %1094 = vst.msk [vmem:[#allocation2 + $0x14] sm:$0xf] %vm1088_vm8, %v1003_v24  ;;  %v4784_v24 = vld [vmem:[#allocation7_spill] sm:$0xff] }
  0xe1   : > { %v1001_v29 = vpop.permute.xlu0 %1000  ;;  %1185 = vrot.lane.b32.xlu1 %v3908_v19, %s3030_s25 }
  0xe2   : > { %1093 = vst.msk [vmem:[#allocation2 + $0x10] sm:$0xf] %vm1088_vm8, %v1001_v29 }
  0xe3   : > { %1183 = vrot.lane.b32.xlu0 %v3911_v56, %s3030_s25  ;;  %v1007_v62 = vpop.permute.xlu1 %1006 }
  0xe4   : > { %1096 = vst.msk [vmem:[#allocation2 + $0x1c] sm:$0xf] %vm1088_vm8, %v1007_v62 }
  0xe5   : > { %v1005_v43 = vpop.permute.xlu0 %1004  ;;  %1278 = vrot.lane.b32.xlu1 %v4781_v2, %s3031_s26  ;;  %v4786_v2 = vld [vmem:[#allocation11_spill] sm:$0xff] }
  0xe6   : > { %1095 = vst.msk [vmem:[#allocation2 + $0x18] sm:$0xf] %vm1088_vm8, %v1005_v43  ;;  %v4785_v43 = vld [vmem:[#allocation9_spill] sm:$0xff] }
  0xe7   : > { %1276 = vrot.lane.b32.xlu0 %v4782_v47, %s3031_s26  ;;  %v1011_v51 = vpop.permute.xlu1 %1010 }
  0xe8   : > { %1098 = vst.msk [vmem:[#allocation2 + $0x24] sm:$0xf] %vm1088_vm8, %v1011_v51 }
  0xe9   : > { %v1009_v0 = vpop.permute.xlu0 %1008  ;;  %1282 = vrot.lane.b32.xlu1 %v4783_v1, %s3031_s26 }
  0xea   : > { %1097 = vst.msk [vmem:[#allocation2 + $0x20] sm:$0xf] %vm1088_vm8, %v1009_v0  ;;  %v4787_v0 = vld [vmem:[#allocation13_spill] sm:$0xff] }
  0xeb   : > { %1280 = vrot.lane.b32.xlu0 %v4784_v24, %s3031_s26  ;;  %v1015_v29 = vpop.permute.xlu1 %1014 }
  0xec   : > { %1100 = vst.msk [vmem:[#allocation2 + $0x2c] sm:$0xf] %vm1088_vm8, %v1015_v29  ;;  %v4788_v29 = vld [vmem:[#allocation15_spill] sm:$0xff] }
  0xed   : > { %v1013_v62 = vpop.permute.xlu0 %1012  ;;  %1286 = vrot.lane.b32.xlu1 %v4785_v43, %s3031_s26 }
  0xee   : > { %1099 = vst.msk [vmem:[#allocation2 + $0x28] sm:$0xf] %vm1088_vm8, %v1013_v62 }
  0xef   : > { %1284 = vrot.lane.b32.xlu0 %v4786_v2, %s3031_s26  ;;  %v1019_v47 = vpop.permute.xlu1 %1018 }
  0xf0   : > { %1102 = vst.msk [vmem:[#allocation2 + $0x34] sm:$0xf] %vm1088_vm8, %v1019_v47  ;;  %v4790_v47 = vld [vmem:[#allocation31_spill] sm:$0xff] }
  0xf1   : > { %v1017_v51 = vpop.permute.xlu0 %1016  ;;  %1290 = vrot.lane.b32.xlu1 %v4787_v0, %s3031_s26 }
  0xf2   : > { %1101 = vst.msk [vmem:[#allocation2 + $0x30] sm:$0xf] %vm1088_vm8, %v1017_v51 }
  0xf3   : > { %1288 = vrot.lane.b32.xlu0 %v4788_v29, %s3031_s26  ;;  %v1023_v5 = vpop.permute.xlu1 %1022 }
  0xf4   : > { %1104 = vst.msk [vmem:[#allocation2 + $0x3c] sm:$0xf] %vm1088_vm8, %v1023_v5  ;;  %v4792_v5 = vld [vmem:[#allocation33_spill] sm:$0xff] }
  0xf5   : > { %v1021_v62 = vpop.permute.xlu0 %1020  ;;  %1310 = vrot.lane.b32.xlu1 %v4789_v4, %s3031_s26 }
  0xf6   : > { %1103 = vst.msk [vmem:[#allocation2 + $0x38] sm:$0xf] %vm1088_vm8, %v1021_v62 }
  0xf7   : > { %1308 = vrot.lane.b32.xlu0 %v4790_v47, %s3031_s26  ;;  %v1027_v58 = vpop.permute.xlu1 %1026 }
  0xf8   : > { %1106 = vst.msk [vmem:[#allocation2 + $0x44] sm:$0xf] %vm1088_vm8, %v1027_v58 }
  0xf9   : > { %v1025_v51 = vpop.permute.xlu0 %1024  ;;  %1314 = vrot.lane.b32.xlu1 %v4791_v50, %s3031_s26 }
  0xfa   : > { %1105 = vst.msk [vmem:[#allocation2 + $0x40] sm:$0xf] %vm1088_vm8, %v1025_v51 }
  0xfb   : > { %1312 = vrot.lane.b32.xlu0 %v4792_v5, %s3031_s26  ;;  %v1031_v63 = vpop.permute.xlu1 %1030 }
  0xfc   : > { %1108 = vst.msk [vmem:[#allocation2 + $0x4c] sm:$0xf] %vm1088_vm8, %v1031_v63 }
  0xfd   : > { %v1029_v62 = vpop.permute.xlu0 %1028  ;;  %1415 = vrot.lane.b32.xlu1 %v3592_v18, %s3032_s27 }
  0xfe   : > { %1107 = vst.msk [vmem:[#allocation2 + $0x48] sm:$0xf] %vm1088_vm8, %v1029_v62 }
  0xff   : > { %1413 = vrot.lane.b32.xlu0 %v3598_v10, %s3032_s27  ;;  %v1035_v58 = vpop.permute.xlu1 %1034 }
 0x100   : > { %1110 = vst.msk [vmem:[#allocation2 + $0x54] sm:$0xf] %vm1088_vm8, %v1035_v58 }
 0x101   : > { %v1033_v51 = vpop.permute.xlu0 %1032  ;;  %1447 = vrot.lane.b32.xlu1 %v3712_v3, %s3032_s27 }
 0x102   : > { %1109 = vst.msk [vmem:[#allocation2 + $0x50] sm:$0xf] %vm1088_vm8, %v1033_v51 }
 0x103   : > { %1445 = vrot.lane.b32.xlu0 %v3718_v39, %s3032_s27  ;;  %v1039_v63 = vpop.permute.xlu1 %1038 }
 0x104   : > { %1112 = vst.msk [vmem:[#allocation2 + $0x5c] sm:$0xf] %vm1088_vm8, %v1039_v63 }
 0x105   : > { %v1037_v62 = vpop.permute.xlu0 %1036  ;;  %1419 = vrot.lane.b32.xlu1 %v3607_v46, %s3032_s27 }
 0x106   : > { %1111 = vst.msk [vmem:[#allocation2 + $0x58] sm:$0xf] %vm1088_vm8, %v1037_v62 }
 0x107   : > { %1417 = vrot.lane.b32.xlu0 %v3613_v61, %s3032_s27  ;;  %v1043_v18 = vpop.permute.xlu1 %1042 }
 0x108   : > { %1114 = vst.msk [vmem:[#allocation2 + $0x64] sm:$0xf] %vm1088_vm8, %v1043_v18 }
 0x109   : > { %v1041_v10 = vpop.permute.xlu0 %1040  ;;  %1451 = vrot.lane.b32.xlu1 %v3727_v14, %s3032_s27 }
 0x10a   : > { %1113 = vst.msk [vmem:[#allocation2 + $0x60] sm:$0xf] %vm1088_vm8, %v1041_v10 }
 0x10b   : > { %1449 = vrot.lane.b32.xlu0 %v3733_v28, %s3032_s27  ;;  %v1047_v58 = vpop.permute.xlu1 %1046 }
 0x10c   : > { %1116 = vst.msk [vmem:[#allocation2 + $0x6c] sm:$0xf] %vm1088_vm8, %v1047_v58  ;;  %v2986_v58 = vld [vmem:[%s4628_s1 + $0x8] sm:$0xff]  }
 0x10d   : > { %v1045_v51 = vpop.permute.xlu0 %1044  ;;  %1546 = vrot.lane.b32.xlu1 %v3123_v22, %s3033_s28 }
 0x10e   : > { %1115 = vst.msk [vmem:[#allocation2 + $0x68] sm:$0xf] %vm1088_vm8, %v1045_v51 }
 0x10f   : > { %1544 = vrot.lane.b32.xlu0 %v3140_v33, %s3033_s28  ;;  %v1051_v63 = vpop.permute.xlu1 %1050 }
 0x110   : > { %1118 = vst.msk [vmem:[#allocation2 + $0x74] sm:$0xf] %vm1088_vm8, %v1051_v63 }
 0x111   : > { %v1049_v62 = vpop.permute.xlu0 %1048  ;;  %1578 = vrot.lane.b32.xlu1 %v3294_v21, %s3033_s28 }
 0x112   : > { %1117 = vst.msk [vmem:[#allocation2 + $0x70] sm:$0xf] %vm1088_vm8, %v1049_v62  ;;  %v2988_v62 = vld [vmem:[%s4628_s1] sm:$0xff]  }
 0x113   : > { %1576 = vrot.lane.b32.xlu0 %v4776_v45, %s3033_s28  ;;  %v1055_v18 = vpop.permute.xlu1 %1054 }
 0x114   : > { %1120 = vst.msk [vmem:[#allocation2 + $0x7c] sm:$0xf] %vm1088_vm8, %v1055_v18 }
 0x115   : > { %v1053_v10 = vpop.permute.xlu0 %1052  ;;  %1550 = vrot.lane.b32.xlu1 %v3143_v34, %s3033_s28 }
 0x116   : > { %1119 = vst.msk [vmem:[#allocation2 + $0x78] sm:$0xf] %vm1088_vm8, %v1053_v10 }
 0x117   : > { %1548 = vrot.lane.b32.xlu0 %v3154_v44, %s3033_s28  ;;  %v1126_v22 = vpop.permute.xlu1 %1125 }
 0x118   : > { %1221 = vst.msk [vmem:[#allocation2 + $0x4] sm:$0xf] %vm1219_vm9, %v1126_v22 }
 0x119   : > { %v1124_v33 = vpop.permute.xlu0 %1123  ;;  %1582 = vrot.lane.b32.xlu1 %v3318_v53, %s3033_s28 }
 0x11a   : > { %1220 = vst.msk [vmem:[#allocation2] sm:$0xf] %vm1219_vm9, %v1124_v33 }
 0x11b   : > { %1580 = vrot.lane.b32.xlu0 %v4779_v52, %s3033_s28  ;;  %v1130_v21 = vpop.permute.xlu1 %1129 }
 0x11c   : > { %1223 = vst.msk [vmem:[#allocation2 + $0xc] sm:$0xf] %vm1219_vm9, %v1130_v21 }
 0x11d   : > { %v1128_v34 = vpop.permute.xlu0 %1127  ;;  %1699 = vrot.lane.b32.xlu1 %v4783_v1, %s3034_s29  ;;  %v2985_v1 = vld [vmem:[%s4628_s1 + $0x10] ss:$0 sps:$4 sm:$0x33]  }
 0x11e   : > { %1222 = vst.msk [vmem:[#allocation2 + $0x8] sm:$0xf] %vm1219_vm9, %v1128_v34  ;;  %2950 = vmatprep.subr.msk.bf16.mxu0 %vm2144_vm10, %v2985_v1  ;;  %2951 = vmatprep.subr.msk.bf16.mxu1 %vm2144_vm10, %v2985_v1 }
 0x11f   : > { %1697 = vrot.lane.b32.xlu0 %v4784_v24, %s3034_s29  ;;  %v1134_v44 = vpop.permute.xlu1 %1133 }
 0x120   : > { %1225 = vst.msk [vmem:[#allocation2 + $0x14] sm:$0xf] %vm1219_vm9, %v1134_v44  ;;  %v4795_v44 = vld [vmem:[#allocation36_spill] sm:$0xff] }
 0x121   : > { %v1132_v53 = vpop.permute.xlu0 %1131  ;;  %1731 = vrot.lane.b32.xlu1 %v4791_v50, %s3034_s29  ;;  %v2146_v50 = vsel %vm2144_vm10, %v2985_v1, 0 }
 0x122   : > { %1224 = vst.msk [vmem:[#allocation2 + $0x10] sm:$0xf] %vm1219_vm9, %v1132_v53  ;;  %2907 = vmatpush3.bf16.msra.mxu0 %v2146_v50  ;;  %2947 = vmatpush3.bf16.msra.mxu1 %v2146_v50  ;;  %v4796_v53 = vld [vmem:[#allocation37_spill] sm:$0xff] }
 0x123   : > { %1729 = vrot.lane.b32.xlu0 %v4792_v5, %s3034_s29  ;;  %v1138_v45 = vpop.permute.xlu1 %1137  ;;  %2908 = vmatprep.subr.bf16.mxu0 %v2986_v58 }
 0x124   : > { %1227 = vst.msk [vmem:[#allocation2 + $0x1c] sm:$0xf] %vm1219_vm9, %v1138_v45  ;;  %2945 = vmatprep.subr.bf16.mxu1 %v2986_v58 }
 0x125   : > { %v1136_v52 = vpop.permute.xlu0 %1135  ;;  %1703 = vrot.lane.b32.xlu1 %v4785_v43, %s3034_s29  ;;  %v4793_v43 = vld [vmem:[#allocation34_spill] sm:$0xff] }
 0x126   : > { %1226 = vst.msk [vmem:[#allocation2 + $0x18] sm:$0xf] %vm1219_vm9, %v1136_v52  ;;  %2909 = vmatpush3.bf16.msra.mxu0 %v2986_v58  ;;  %2948 = vmatpush3.bf16.msra.mxu1 %v2986_v58 }
 0x127   : > { %1701 = vrot.lane.b32.xlu0 %v4786_v2, %s3034_s29  ;;  %v1142_v24 = vpop.permute.xlu1 %1141  ;;  %v4794_v2 = vld [vmem:[#allocation35_spill] sm:$0xff]  ;;  %2910 = vmatprep.subr.bf16.mxu0 %v2988_v62 }
 0x128   : > { %1229 = vst.msk [vmem:[#allocation2 + $0x24] sm:$0xf] %vm1219_vm9, %v1142_v24  ;;  %2946 = vmatprep.subr.bf16.mxu1 %v2988_v62 }
 0x129   : > { %v1140_v5 = vpop.permute.xlu0 %1139  ;;  %1735 = vrot.lane.b32.xlu1 %v4793_v43, %s3034_s29 }
 0x12a   : > { %1228 = vst.msk [vmem:[#allocation2 + $0x20] sm:$0xf] %vm1219_vm9, %v1140_v5  ;;  %2911 = vmatpush3.bf16.msra.mxu0 %v2988_v62  ;;  %2949 = vmatpush3.bf16.msra.mxu1 %v2988_v62 }
 0x12b   : > { %1733 = vrot.lane.b32.xlu0 %v4794_v2, %s3034_s29  ;;  %v1146_v51 = vpop.permute.xlu1 %1145 }
 0x12c   : > { %1231 = vst.msk [vmem:[#allocation2 + $0x2c] sm:$0xf] %vm1219_vm9, %v1146_v51 }
 0x12d   : > { %v1144_v63 = vpop.permute.xlu0 %1143  ;;  %1836 = vrot.lane.b32.xlu1 %v3607_v46, %s3035_s10 }
 0x12e   : > { %1230 = vst.msk [vmem:[#allocation2 + $0x28] sm:$0xf] %vm1219_vm9, %v1144_v63 }
 0x12f   : > { %1834 = vrot.lane.b32.xlu0 %v3613_v61, %s3035_s10  ;;  %v1150_v18 = vpop.permute.xlu1 %1149 }
 0x130   : > { %1233 = vst.msk [vmem:[#allocation2 + $0x34] sm:$0xf] %vm1219_vm9, %v1150_v18 }
 0x131   : > { %v1148_v10 = vpop.permute.xlu0 %1147  ;;  %1868 = vrot.lane.b32.xlu1 %v3727_v14, %s3035_s10 }
 0x132   : > { %1232 = vst.msk [vmem:[#allocation2 + $0x30] sm:$0xf] %vm1219_vm9, %v1148_v10 }
 0x133   : > { %1866 = vrot.lane.b32.xlu0 %v3733_v28, %s3035_s10  ;;  %v1154_v46 = vpop.permute.xlu1 %1153 }
 0x134   : > { %1235 = vst.msk [vmem:[#allocation2 + $0x3c] sm:$0xf] %vm1219_vm9, %v1154_v46 }
 0x135   : > { %v1152_v61 = vpop.permute.xlu0 %1151  ;;  %1840 = vrot.lane.b32.xlu1 %v3622_v55, %s3035_s10 }
 0x136   : > { %1234 = vst.msk [vmem:[#allocation2 + $0x38] sm:$0xf] %vm1219_vm9, %v1152_v61 }
 0x137   : > { %1838 = vrot.lane.b32.xlu0 %v3628_v17, %s3035_s10  ;;  %v1158_v22 = vpop.permute.xlu1 %1157 }
 0x138   : > { %1237 = vst.msk [vmem:[#allocation2 + $0x44] sm:$0xf] %vm1219_vm9, %v1158_v22 }
 0x139   : > { %v1156_v33 = vpop.permute.xlu0 %1155  ;;  %1872 = vrot.lane.b32.xlu1 %v3742_v31, %s3035_s10 }
 0x13a   : > { %1236 = vst.msk [vmem:[#allocation2 + $0x40] sm:$0xf] %vm1219_vm9, %v1156_v33 }
 0x13b   : > { %1870 = vrot.lane.b32.xlu0 %v3748_v41, %s3035_s10  ;;  %v1162_v14 = vpop.permute.xlu1 %1161 }
 0x13c   : > { %1239 = vst.msk [vmem:[#allocation2 + $0x4c] sm:$0xf] %vm1219_vm9, %v1162_v14 }
 0x13d   : > { %v1160_v28 = vpop.permute.xlu0 %1159  ;;  %1318 = vrot.lane.b32.xlu1 %v4793_v43, %s3031_s26 }
 0x13e   : > { %1238 = vst.msk [vmem:[#allocation2 + $0x48] sm:$0xf] %vm1219_vm9, %v1160_v28 }
 0x13f   : > { %1316 = vrot.lane.b32.xlu0 %v4794_v2, %s3031_s26  ;;  %v1166_v21 = vpop.permute.xlu1 %1165 }
 0x140   : > { %1241 = vst.msk [vmem:[#allocation2 + $0x54] sm:$0xf] %vm1219_vm9, %v1166_v21 }
 0x141   : > { %v1164_v34 = vpop.permute.xlu0 %1163  ;;  %1322 = vrot.lane.b32.xlu1 %v4795_v44, %s3031_s26 }
 0x142   : > { %1240 = vst.msk [vmem:[#allocation2 + $0x50] sm:$0xf] %vm1219_vm9, %v1164_v34 }
 0x143   : > { %1320 = vrot.lane.b32.xlu0 %v4796_v53, %s3031_s26  ;;  %v1170_v45 = vpop.permute.xlu1 %1169 }
 0x144   : > { %1243 = vst.msk [vmem:[#allocation2 + $0x5c] sm:$0xf] %vm1219_vm9, %v1170_v45  ;;  %v4801_v45 = vld [vmem:[#allocation21_spill] sm:$0xff] }
 0x145   : > { %v1168_v52 = vpop.permute.xlu0 %1167  ;;  %1423 = vrot.lane.b32.xlu1 %v3622_v55, %s3032_s27 }
 0x146   : > { %1242 = vst.msk [vmem:[#allocation2 + $0x58] sm:$0xf] %vm1219_vm9, %v1168_v52  ;;  %v4802_v52 = vld [vmem:[#allocation22_spill] sm:$0xff] }
 0x147   : > { %1421 = vrot.lane.b32.xlu0 %v3628_v17, %s3032_s27  ;;  %v1174_v1 = vpop.permute.xlu1 %1173 }
 0x148   : > { %1245 = vst.msk [vmem:[#allocation2 + $0x64] sm:$0xf] %vm1219_vm9, %v1174_v1 }
 0x149   : > { %v1172_v50 = vpop.permute.xlu0 %1171  ;;  %1455 = vrot.lane.b32.xlu1 %v3742_v31, %s3032_s27 }
 0x14a   : > { %1244 = vst.msk [vmem:[#allocation2 + $0x60] sm:$0xf] %vm1219_vm9, %v1172_v50  ;;  %v4804_v50 = vld [vmem:[#allocation40_spill] sm:$0xff] }
 0x14b   : > { %1453 = vrot.lane.b32.xlu0 %v3748_v41, %s3032_s27  ;;  %v1178_v24 = vpop.permute.xlu1 %1177 }
 0x14c   : > { %1247 = vst.msk [vmem:[#allocation2 + $0x6c] sm:$0xf] %vm1219_vm9, %v1178_v24 }
 0x14d   : > { %v1176_v5 = vpop.permute.xlu0 %1175  ;;  %1427 = vrot.lane.b32.xlu1 %v3637_v13, %s3032_s27 }
 0x14e   : > { %1246 = vst.msk [vmem:[#allocation2 + $0x68] sm:$0xf] %vm1219_vm9, %v1176_v5 }
 0x14f   : > { %1425 = vrot.lane.b32.xlu0 %v3643_v20, %s3032_s27  ;;  %v1182_v55 = vpop.permute.xlu1 %1181 }
 0x150   : > { %1249 = vst.msk [vmem:[#allocation2 + $0x74] sm:$0xf] %vm1219_vm9, %v1182_v55 }
 0x151   : > { %v1180_v17 = vpop.permute.xlu0 %1179  ;;  %1459 = vrot.lane.b32.xlu1 %v3757_v38, %s3032_s27 }
 0x152   : > { %1248 = vst.msk [vmem:[#allocation2 + $0x70] sm:$0xf] %vm1219_vm9, %v1180_v17 }
 0x153   : > { %1457 = vrot.lane.b32.xlu0 %v3763_v6, %s3032_s27  ;;  %v1186_v31 = vpop.permute.xlu1 %1185 }
 0x154   : > { %1251 = vst.msk [vmem:[#allocation2 + $0x7c] sm:$0xf] %vm1219_vm9, %v1186_v31 }
 0x155   : > { %v1184_v41 = vpop.permute.xlu0 %1183  ;;  %1554 = vrot.lane.b32.xlu1 %v3163_v49, %s3033_s28 }
 0x156   : > { %1250 = vst.msk [vmem:[#allocation2 + $0x78] sm:$0xf] %vm1219_vm9, %v1184_v41 }
 0x157   : > { %1552 = vrot.lane.b32.xlu0 %v3176_v54, %s3033_s28  ;;  %v1279_v58 = vpop.permute.xlu1 %1278 }
 0x158   : > { %1374 = vst.msk [vmem:[#allocation2 + $0x4] sm:$0xf] %vm1372_vm11, %v1279_v58  ;;  %v4805_v58 = vld [vmem:[#allocation45_spill] sm:$0xff] }
 0x159   : > { %v1277_v43 = vpop.permute.xlu0 %1276  ;;  %1586 = vrot.lane.b32.xlu1 %v4778_v32, %s3033_s28 }
 0x15a   : > { %1373 = vst.msk [vmem:[#allocation2] sm:$0xf] %vm1372_vm11, %v1277_v43  ;;  %v4806_v43 = vld [vmem:[#allocation46_spill] sm:$0xff] }
 0x15b   : > { %1584 = vrot.lane.b32.xlu0 %v3350_v37, %s3033_s28  ;;  %v1283_v2 = vpop.permute.xlu1 %1282 }
 0x15c   : > { %1376 = vst.msk [vmem:[#allocation2 + $0xc] sm:$0xf] %vm1372_vm11, %v1283_v2 }
 0x15d   : > { %v1281_v49 = vpop.permute.xlu0 %1280  ;;  %1558 = vrot.lane.b32.xlu1 %v3185_v59, %s3033_s28 }
 0x15e   : > { %1375 = vst.msk [vmem:[#allocation2 + $0x8] sm:$0xf] %vm1372_vm11, %v1281_v49 }
 0x15f   : > { %1556 = vrot.lane.b32.xlu0 %v3200_v9, %s3033_s28  ;;  %v1287_v54 = vpop.permute.xlu1 %1286 }
 0x160   : > { %1378 = vst.msk [vmem:[#allocation2 + $0x14] sm:$0xf] %vm1372_vm11, %v1287_v54 }
 0x161   : > { %v1285_v51 = vpop.permute.xlu0 %1284  ;;  %1590 = vrot.lane.b32.xlu1 %v3358_v48, %s3033_s28 }
 0x162   : > { %1377 = vst.msk [vmem:[#allocation2 + $0x10] sm:$0xf] %vm1372_vm11, %v1285_v51 }
 0x163   : > { %1588 = vrot.lane.b32.xlu0 %v3374_v8, %s3033_s28  ;;  %v1291_v37 = vpop.permute.xlu1 %1290 }
 0x164   : > { %1380 = vst.msk [vmem:[#allocation2 + $0x1c] sm:$0xf] %vm1372_vm11, %v1291_v37 }
 0x165   : > { %v1289_v32 = vpop.permute.xlu0 %1288  ;;  %1707 = vrot.lane.b32.xlu1 %v4787_v0, %s3034_s29  ;;  %v4797_v0 = vld [vmem:[#allocation17_spill] sm:$0xff] }
 0x166   : > { %1379 = vst.msk [vmem:[#allocation2 + $0x18] sm:$0xf] %vm1372_vm11, %v1289_v32 }
 0x167   : > { %1705 = vrot.lane.b32.xlu0 %v4788_v29, %s3034_s29  ;;  %v1311_v59 = vpop.permute.xlu1 %1310  ;;  %v4798_v29 = vld [vmem:[#allocation20_spill] sm:$0xff] }
 0x168   : > { %1390 = vst.msk [vmem:[#allocation2 + $0x44] sm:$0xf] %vm1372_vm11, %v1311_v59 }
 0x169   : > { %v1309_v9 = vpop.permute.xlu0 %1308  ;;  %1739 = vrot.lane.b32.xlu1 %v4795_v44, %s3034_s29 }
 0x16a   : > { %1389 = vst.msk [vmem:[#allocation2 + $0x40] sm:$0xf] %vm1372_vm11, %v1309_v9 }
 0x16b   : > { %1737 = vrot.lane.b32.xlu0 %v4796_v53, %s3034_s29  ;;  %v1315_v8 = vpop.permute.xlu1 %1314 }
 0x16c   : > { %1392 = vst.msk [vmem:[#allocation2 + $0x4c] sm:$0xf] %vm1372_vm11, %v1315_v8 }
 0x16d   : > { %v1313_v48 = vpop.permute.xlu0 %1312  ;;  %1711 = vrot.lane.b32.xlu1 %v4797_v0, %s3034_s29 }
 0x16e   : > { %1391 = vst.msk [vmem:[#allocation2 + $0x48] sm:$0xf] %vm1372_vm11, %v1313_v48 }
 0x16f   : > { %1709 = vrot.lane.b32.xlu0 %v4798_v29, %s3034_s29  ;;  %v1416_v63 = vpop.permute.xlu1 %1415 }
 0x170   : > { %1511 = vst.msk [vmem:[#allocation2 + $0x4] sm:$0xf] %vm1509_vm12, %v1416_v63 }
 0x171   : > { %v1414_v62 = vpop.permute.xlu0 %1413  ;;  %1743 = vrot.lane.b32.xlu1 %v3533_v30, %s3034_s29 }
 0x172   : > { %1510 = vst.msk [vmem:[#allocation2] sm:$0xf] %vm1509_vm12, %v1414_v62 }
 0x173   : > { %1741 = vrot.lane.b32.xlu0 %v3540_v60, %s3034_s29  ;;  %v1448_v18 = vpop.permute.xlu1 %1447 }
 0x174   : > { %1527 = vst.msk [vmem:[#allocation2 + $0x44] sm:$0xf] %vm1509_vm12, %v1448_v18  ;;  %v4809_v18 = vld [vmem:[#allocation41_spill] sm:$0xff] }
 0x175   : > { %v1446_v10 = vpop.permute.xlu0 %1445  ;;  %1844 = vrot.lane.b32.xlu1 %v3637_v13, %s3035_s10  ;;  %v4799_v13 = vld [vmem:[#allocation43_spill] sm:$0xff] }
 0x176   : > { %1526 = vst.msk [vmem:[#allocation2 + $0x40] sm:$0xf] %vm1509_vm12, %v1446_v10  ;;  %v4810_v10 = vld [vmem:[#allocation42_spill] sm:$0xff] }
 0x177   : > { %1842 = vrot.lane.b32.xlu0 %v3643_v20, %s3035_s10  ;;  %v1420_v46 = vpop.permute.xlu1 %1419  ;;  %v4800_v20 = vld [vmem:[#allocation44_spill] sm:$0xff] }
 0x178   : > { %1513 = vst.msk [vmem:[#allocation2 + $0xc] sm:$0xf] %vm1509_vm12, %v1420_v46 }
 0x179   : > { %v1418_v61 = vpop.permute.xlu0 %1417  ;;  %1876 = vrot.lane.b32.xlu1 %v3757_v38, %s3035_s10 }
 0x17a   : > { %1512 = vst.msk [vmem:[#allocation2 + $0x8] sm:$0xf] %vm1509_vm12, %v1418_v61 }
 0x17b   : > { %1874 = vrot.lane.b32.xlu0 %v3763_v6, %s3035_s10  ;;  %v1452_v22 = vpop.permute.xlu1 %1451 }
 0x17c   : > { %1529 = vst.msk [vmem:[#allocation2 + $0x4c] sm:$0xf] %vm1509_vm12, %v1452_v22 }
 0x17d   : > { %v1450_v33 = vpop.permute.xlu0 %1449  ;;  %1848 = vrot.lane.b32.xlu1 %v4799_v13, %s3035_s10 }
 0x17e   : > { %1528 = vst.msk [vmem:[#allocation2 + $0x48] sm:$0xf] %vm1509_vm12, %v1450_v33 }
 0x17f   : > { %1846 = vrot.lane.b32.xlu0 %v4800_v20, %s3035_s10  ;;  %v1547_v14 = vpop.permute.xlu1 %1546 }
 0x180   : > { %1642 = vst.msk [vmem:[#allocation2 + $0x4] sm:$0xf] %vm1640_vm13, %v1547_v14  ;;  %v4811_v14 = vld [vmem:[#allocation47_spill] sm:$0xff] }
 0x181   : > { %v1545_v38 = vpop.permute.xlu0 %1544  ;;  %1880 = vrot.lane.b32.xlu1 %v3772_v35, %s3035_s10 }
 0x182   : > { %1641 = vst.msk [vmem:[#allocation2] sm:$0xf] %vm1640_vm13, %v1545_v38  ;;  %v4812_v38 = vld [vmem:[#allocation48_spill] sm:$0xff] }
 0x183   : > { %1878 = vrot.lane.b32.xlu0 %v3778_v57, %s3035_s10  ;;  %v1579_v6 = vpop.permute.xlu1 %1578 }
 0x184   : > { %1658 = vst.msk [vmem:[#allocation2 + $0x44] sm:$0xf] %vm1640_vm13, %v1579_v6  ;;  %v1262_v6 = vshll.u32 %v3908_v19, 16 }
 0x185   : > { %v1577_v28 = vpop.permute.xlu0 %1576  ;;  %1294 = vrot.lane.b32.xlu1 %v4797_v0, %s3031_s26  ;;  %v4807_v0 = vld [vmem:[#allocation24_spill] sm:$0xff] }
 0x186   : > { %1657 = vst.msk [vmem:[#allocation2 + $0x40] sm:$0xf] %vm1640_vm13, %v1577_v28 }
 0x187   : > { %1292 = vrot.lane.b32.xlu0 %v4798_v29, %s3031_s26  ;;  %v1551_v21 = vpop.permute.xlu1 %1550  ;;  %v4808_v29 = vld [vmem:[#allocation26_spill] sm:$0xff] }
 0x188   : > { %1644 = vst.msk [vmem:[#allocation2 + $0xc] sm:$0xf] %vm1640_vm13, %v1551_v21  ;;  %v1256_v21 = vshll.u32 %v3911_v56, 16 }
 0x189   : > { %v1549_v34 = vpop.permute.xlu0 %1548  ;;  %1326 = vrot.lane.b32.xlu1 %v3533_v30, %s3031_s26 }
 0x18a   : > { %1643 = vst.msk [vmem:[#allocation2 + $0x8] sm:$0xf] %vm1640_vm13, %v1549_v34 }
 0x18b   : > { %1324 = vrot.lane.b32.xlu0 %v3540_v60, %s3031_s26  ;;  %v1583_v44 = vpop.permute.xlu1 %1582  ;;  %v4803_v60 = vld [vmem:[#allocation38_spill] sm:$0xff] }
 0x18c   : > { %1660 = vst.msk [vmem:[#allocation2 + $0x4c] sm:$0xf] %vm1640_vm13, %v1583_v44  ;;  %v1264_v44 = vrot.slane %v1262_v6, 5 }
 0x18d   : > { %v1581_v53 = vpop.permute.xlu0 %1580  ;;  %1298 = vrot.lane.b32.xlu1 %v4801_v45, %s3031_s26 }
 0x18e   : > { %1659 = vst.msk [vmem:[#allocation2 + $0x48] sm:$0xf] %vm1640_vm13, %v1581_v53 }
 0x18f   : > { %1296 = vrot.lane.b32.xlu0 %v4802_v52, %s3031_s26  ;;  %v1700_v1 = vpop.permute.xlu1 %1699 }
 0x190   : > { %1795 = vst.msk [vmem:[#allocation2 + $0x4] sm:$0xf] %vm1793_vm14, %v1700_v1 }
 0x191   : > { %v1698_v30 = vpop.permute.xlu0 %1697  ;;  %1330 = vrot.lane.b32.xlu1 %v4803_v60, %s3031_s26 }
 0x192   : > { %1794 = vst.msk [vmem:[#allocation2] sm:$0xf] %vm1793_vm14, %v1698_v30  ;;  %v1258_v30 = vrot.slane %v1256_v21, 5  ;;  %v4391_v21 = vld [vmem:[%s3085_s22 + $0xcc] sm:$0xf] }
 0x193   : > { %1328 = vrot.lane.b32.xlu0 %v4804_v50, %s3031_s26  ;;  %v1732_v24 = vpop.permute.xlu1 %1731 }
 0x194   : > { %1811 = vst.msk [vmem:[#allocation2 + $0x44] sm:$0xf] %vm1793_vm14, %v1732_v24 }
 0x195   : > { %v1730_v5 = vpop.permute.xlu0 %1729  ;;  %1431 = vrot.lane.b32.xlu1 %v4799_v13, %s3032_s27 }
 0x196   : > { %1810 = vst.msk [vmem:[#allocation2 + $0x40] sm:$0xf] %vm1793_vm14, %v1730_v5 }
 0x197   : > { %1429 = vrot.lane.b32.xlu0 %v4800_v20, %s3032_s27  ;;  %v1704_v55 = vpop.permute.xlu1 %1703 }
 0x198   : > { %1797 = vst.msk [vmem:[#allocation2 + $0xc] sm:$0xf] %vm1793_vm14, %v1704_v55 }
 0x199   : > { %v1702_v17 = vpop.permute.xlu0 %1701  ;;  %1463 = vrot.lane.b32.xlu1 %v3772_v35, %s3032_s27 }
 0x19a   : > { %1796 = vst.msk [vmem:[#allocation2 + $0x8] sm:$0xf] %vm1793_vm14, %v1702_v17 }
 0x19b   : > { %1461 = vrot.lane.b32.xlu0 %v3778_v57, %s3032_s27  ;;  %v1736_v31 = vpop.permute.xlu1 %1735 }
 0x19c   : > { %1813 = vst.msk [vmem:[#allocation2 + $0x4c] sm:$0xf] %vm1793_vm14, %v1736_v31 }
 0x19d   : > { %v1734_v41 = vpop.permute.xlu0 %1733  ;;  %1435 = vrot.lane.b32.xlu1 %v4805_v58, %s3032_s27 }
 0x19e   : > { %1812 = vst.msk [vmem:[#allocation2 + $0x48] sm:$0xf] %vm1793_vm14, %v1734_v41 }
 0x19f   : > { %1433 = vrot.lane.b32.xlu0 %v4806_v43, %s3032_s27  ;;  %v1837_v2 = vpop.permute.xlu1 %1836 }
 0x1a0   : > { %1932 = vst.msk [vmem:[#allocation2 + $0x4] sm:$0xf] %vm1930_vm15, %v1837_v2 }
 0x1a1   : > { %v1835_v35 = vpop.permute.xlu0 %1834  ;;  %1467 = vrot.lane.b32.xlu1 %v3789_v16, %s3032_s27 }
 0x1a2   : > { %1931 = vst.msk [vmem:[#allocation2] sm:$0xf] %vm1930_vm15, %v1835_v35  ;;  %v4813_v35 = vld [vmem:[#allocation27_spill] sm:$0xff] }
 0x1a3   : > { %1465 = vrot.lane.b32.xlu0 %v3794_v23, %s3032_s27  ;;  %v1869_v57 = vpop.permute.xlu1 %1868 }
 0x1a4   : > { %1948 = vst.msk [vmem:[#allocation2 + $0x44] sm:$0xf] %vm1930_vm15, %v1869_v57  ;;  %v4814_v57 = vld [vmem:[#allocation28_spill] sm:$0xff] }
 0x1a5   : > { %v1867_v49 = vpop.permute.xlu0 %1866  ;;  %1562 = vrot.lane.b32.xlu1 %v3209_v15, %s3033_s28 }
 0x1a6   : > { %1947 = vst.msk [vmem:[#allocation2 + $0x40] sm:$0xf] %vm1930_vm15, %v1867_v49 }
 0x1a7   : > { %1560 = vrot.lane.b32.xlu0 %v3221_v27, %s3033_s28  ;;  %v1841_v54 = vpop.permute.xlu1 %1840 }
 0x1a8   : > { %1934 = vst.msk [vmem:[#allocation2 + $0xc] sm:$0xf] %vm1930_vm15, %v1841_v54 }
 0x1a9   : > { %v1839_v51 = vpop.permute.xlu0 %1838  ;;  %v2987_v37 = vld [vmem:[#allocation2] sm:$0xff]   ;;  %1594 = vrot.lane.b32.xlu1 %v3385_v40, %s3033_s28 }
 0x1aa   : > { %1933 = vst.msk [vmem:[#allocation2 + $0x8] sm:$0xf] %vm1930_vm15, %v1839_v51  ;;  %2912 = vmatprep.mubr.msk.bf16.mxu0 %vm2095_vm0, %v2987_v37 }
 0x1ab   : > { %1592 = vrot.lane.b32.xlu0 %v4780_v25, %s3033_s28  ;;  %v1873_v15 = vpop.permute.xlu1 %1872 }
 0x1ac   : > { %1950 = vst.msk [vmem:[#allocation2 + $0x4c] sm:$0xf] %vm1930_vm15, %v1873_v15 }
 0x1ad   : > { %v1871_v27 = vpop.permute.xlu0 %1870  ;;  %v2989_v32 = vld [vmem:[#allocation2 + $0x40] sm:$0xff]   ;;  %1566 = vrot.lane.b32.xlu1 %v3232_v36, %s3033_s28 }
 0x1ae   : > { %1949 = vst.msk [vmem:[#allocation2 + $0x48] sm:$0xf] %vm1930_vm15, %v1871_v27  ;;  %2928 = vmatprep.mubr.msk.bf16.mxu1 %vm2095_vm0, %v2989_v32 }
 0x1af   : > { %1564 = vrot.lane.b32.xlu0 %v3239_v42, %s3033_s28  ;;  %v1319_v40 = vpop.permute.xlu1 %1318 }
 0x1b0   : > { %1394 = vst.msk [vmem:[#allocation2 + $0x54] sm:$0xf] %vm1372_vm11, %v1319_v40  ;;  %v1408_v40 = vrot.slane %v3908_v19, 5 }
 0x1b1   : > { %v1317_v25 = vpop.permute.xlu0 %1316  ;;  %v2990_v59 = vld [vmem:[#allocation2 + $0x8] sm:$0xff]   ;;  %1598 = vrot.lane.b32.xlu1 %v3405_v12, %s3033_s28 }
 0x1b2   : > { %1393 = vst.msk [vmem:[#allocation2 + $0x50] sm:$0xf] %vm1372_vm11, %v1317_v25  ;;  %2913 = vmatmul.mubr.msk.bf16.vlgmr.msra.gmra.mxu0 %vm2095_vm0, %v2990_v59 }
 0x1b3   : > { %1596 = vrot.lane.b32.xlu0 %v3422_v11, %s3033_s28  ;;  %v1323_v36 = vpop.permute.xlu1 %1322 }
 0x1b4   : > { %1396 = vst.msk [vmem:[#allocation2 + $0x5c] sm:$0xf] %vm1372_vm11, %v1323_v36  ;;  %v1410_v36 = vrot.slane %v1408_v40, 4 }
 0x1b5   : > { %v1321_v42 = vpop.permute.xlu0 %1320  ;;  %v2991_v9 = vld [vmem:[#allocation2 + $0x48] sm:$0xff]   ;;  %1715 = vrot.lane.b32.xlu1 %v4801_v45, %s3034_s29 }
 0x1b6   : > { %1395 = vst.msk [vmem:[#allocation2 + $0x58] sm:$0xf] %vm1372_vm11, %v1321_v42  ;;  %2929 = vmatmul.mubr.msk.bf16.vlgmr.msra.gmra.mxu1 %vm2095_vm0, %v2991_v9 }
 0x1b7   : > { %1713 = vrot.lane.b32.xlu0 %v4802_v52, %s3034_s29  ;;  %v1424_v12 = vpop.permute.xlu1 %1423  ;;  %v276_v52 = vld [vmem:[%s3085_s22 + $0xc8] sm:$0x1] }
 0x1b8   : > { %1515 = vst.msk [vmem:[#allocation2 + $0x14] sm:$0xf] %vm1509_vm12, %v1424_v12  ;;  %v1272_v24 = vshll.u32 %v276_v52, 16  ;;  %v1411_v42 = vrot.slane %v276_v52, 5  ;;  %v2686_v12 = vrot.slane %v3911_v56, 9 }
 0x1b9   : > { %v1422_v11 = vpop.permute.xlu0 %1421  ;;  %1747 = vrot.lane.b32.xlu1 %v4803_v60, %s3034_s29 }
 0x1ba   : > { %1514 = vst.msk [vmem:[#allocation2 + $0x10] sm:$0xf] %vm1509_vm12, %v1422_v11  ;;  %v1274_v41 = vrot.slane %v1272_v24, 5  ;;  %v279_v24 = vld [vmem:[%s3085_s22 + $0xd4] sm:$0x1] }
 0x1bb   : > { %1745 = vrot.lane.b32.xlu0 %v4804_v50, %s3034_s29  ;;  %v1456_v8 = vpop.permute.xlu1 %1455 }
 0x1bc   : > { %1531 = vst.msk [vmem:[#allocation2 + $0x54] sm:$0xf] %vm1509_vm12, %v1456_v8  ;;  %v4816_v8 = vld [vmem:[#allocation49_spill] sm:$0xff] }
 0x1bd   : > { %v1454_v48 = vpop.permute.xlu0 %1453  ;;  %1719 = vrot.lane.b32.xlu1 %v4807_v0, %s3034_s29 }
 0x1be   : > { %1530 = vst.msk [vmem:[#allocation2 + $0x50] sm:$0xf] %vm1509_vm12, %v1454_v48  ;;  %v4817_v48 = vld [vmem:[#allocation23_spill] sm:$0xff] }
 0x1bf   : > { %1717 = vrot.lane.b32.xlu0 %v4808_v29, %s3034_s29  ;;  %v1428_v63 = vpop.permute.xlu1 %1427 }
 0x1c0   : > { %1517 = vst.msk [vmem:[#allocation2 + $0x1c] sm:$0xf] %vm1509_vm12, %v1428_v63 }
 0x1c1   : > { %v1426_v62 = vpop.permute.xlu0 %1425  ;;  %1751 = vrot.lane.b32.xlu1 %v4809_v18, %s3034_s29 }
 0x1c2   : > { %1516 = vst.msk [vmem:[#allocation2 + $0x18] sm:$0xf] %vm1509_vm12, %v1426_v62 }
 0x1c3   : > { %1749 = vrot.lane.b32.xlu0 %v4810_v10, %s3034_s29  ;;  %v1460_v46 = vpop.permute.xlu1 %1459 }
 0x1c4   : > { %1533 = vst.msk [vmem:[#allocation2 + $0x5c] sm:$0xf] %vm1509_vm12, %v1460_v46 }
 0x1c5   : > { %v1458_v61 = vpop.permute.xlu0 %1457  ;;  %1852 = vrot.lane.b32.xlu1 %v4805_v58, %s3035_s10 }
 0x1c6   : > { %1532 = vst.msk [vmem:[#allocation2 + $0x58] sm:$0xf] %vm1509_vm12, %v1458_v61  ;;  %v4819_v61 = vld [vmem:[#allocation8_spill] sm:$0xff] }
 0x1c7   : > { %1850 = vrot.lane.b32.xlu0 %v4806_v43, %s3035_s10  ;;  %v1555_v22 = vpop.permute.xlu1 %1554 }
 0x1c8   : > { %1646 = vst.msk [vmem:[#allocation2 + $0x14] sm:$0xf] %vm1640_vm13, %v1555_v22  ;;  %v4820_v22 = vld [vmem:[#allocation10_spill] sm:$0xff] }
 0x1c9   : > { %v1553_v33 = vpop.permute.xlu0 %1552  ;;  %1884 = vrot.lane.b32.xlu1 %v3789_v16, %s3035_s10  ;;  %v1266_v16 = vshrl.u32 %v3908_v19, 16 }
 0x1ca   : > { %1645 = vst.msk [vmem:[#allocation2 + $0x10] sm:$0xf] %vm1640_vm13, %v1553_v33 }
 0x1cb   : > { %1882 = vrot.lane.b32.xlu0 %v3794_v23, %s3035_s10  ;;  %v1587_v13 = vpop.permute.xlu1 %1586  ;;  %v1253_v23 = vshrl.u32 %v3911_v56, 16  ;;  %v1268_v53 = vrot.slane %v1266_v16, 4  ;;  %v4821_v16 = vld [vmem:[#allocation12_spill] sm:$0xff] }
 0x1cc   : > { %1662 = vst.msk [vmem:[#allocation2 + $0x54] sm:$0xf] %vm1640_vm13, %v1587_v13 }
 0x1cd   : > { %v1585_v20 = vpop.permute.xlu0 %1584  ;;  %1856 = vrot.lane.b32.xlu1 %v4811_v14, %s3035_s10  ;;  %v1255_v1 = vrot.slane %v1253_v23, 4  ;;  %v1269_v50 = vor.u32 %v1268_v53, %v1264_v44  ;;  %v4822_v23 = vld [vmem:[#allocation14_spill] sm:$0xff]  ;;  %v1677_v53 = vshll.u32 %v4391_v21, 16 }
 0x1ce   : > { %1661 = vst.msk [vmem:[#allocation2 + $0x50] sm:$0xf] %vm1640_vm13, %v1585_v20 }
 0x1cf   : > { %1854 = vrot.lane.b32.xlu0 %v4812_v38, %s3035_s10  ;;  %v1559_v28 = vpop.permute.xlu1 %1558  ;;  %v1259_v55 = vor.u32 %v1258_v30, %v1255_v1  ;;  %v1270_v31 = vrot.slane %v1269_v50, 4 }
 0x1d0   : > { %1648 = vst.msk [vmem:[#allocation2 + $0x1c] sm:$0xf] %vm1640_vm13, %v1559_v28  ;;  %v4383_v28 = vld [vmem:[%s3085_s22 + $0xd0] sm:$0xf]  ;;  %s4528_s22 = scalar_lea.vmem %s4631_s4, %s2759_s19 }
 0x1d1   : > { %v1557_v34 = vpop.permute.xlu0 %1556  ;;  %1888 = vrot.lane.b32.xlu1 %v3805_v7, %s3035_s10  ;;  %v1260_v43 = vrot.slane %v1259_v55, 4  ;;  %v4317_v54 = vsel %vm3134_vm3, %v1270_v31, %v1274_v41  ;;  %v1829_v49 = vrot.slane %v4383_v28, 5 }
 0x1d2   : > { %1647 = vst.msk [vmem:[#allocation2 + $0x18] sm:$0xf] %vm1640_vm13, %v1557_v34 }
 0x1d3   : > { %1886 = vrot.lane.b32.xlu0 %v3809_v26, %s3035_s10  ;;  %v1591_v45 = vpop.permute.xlu1 %1590  ;;  %v4321_v37 = vsel %vm3134_vm3, %v1260_v43, %v1264_v44  ;;  %v1674_v44 = vshrl.u32 %v4391_v21, 16 }
 0x1d4   : > { %1664 = vst.msk [vmem:[#allocation2 + $0x5c] sm:$0xf] %vm1640_vm13, %v1591_v45 }
 0x1d5   : > { %v1589_v60 = vpop.permute.xlu0 %1588  ;;  %1302 = vrot.lane.b32.xlu1 %v4807_v0, %s3031_s26  ;;  %v4351_v0 = vsel %vm3553_vm6, %v1410_v36, %v1411_v42  ;;  %v1676_v30 = vrot.slane %v1674_v44, 4  ;;  %v2687_v36 = vrot.slane %v4391_v21, 9 }
 0x1d6   : > { %1663 = vst.msk [vmem:[#allocation2 + $0x58] sm:$0xf] %vm1640_vm13, %v1589_v60  ;;  %v1679_v60 = vrot.slane %v1677_v53, 5 }
 0x1d7   : > { %1300 = vrot.lane.b32.xlu0 %v4808_v29, %s3031_s26  ;;  %v1708_v5 = vpop.permute.xlu1 %1707  ;;  %v4355_v29 = vsel %vm3553_vm6, %v2686_v12, %v1408_v40 }
 0x1d8   : > { %1799 = vst.msk [vmem:[#allocation2 + $0x14] sm:$0xf] %vm1793_vm14, %v1708_v5  ;;  %v1680_v41 = vor.u32 %v1679_v60, %v1676_v30 }
 0x1d9   : > { %v1706_v17 = vpop.permute.xlu0 %1705  ;;  %1334 = vrot.lane.b32.xlu1 %v4809_v18, %s3031_s26 }
 0x1da   : > { %1798 = vst.msk [vmem:[#allocation2 + $0x10] sm:$0xf] %vm1793_vm14, %v1706_v17  ;;  %v1693_v17 = vshll.u32 %v279_v24, 16 }
 0x1db   : > { %1332 = vrot.lane.b32.xlu0 %v4810_v10, %s3031_s26  ;;  %v1740_v58 = vpop.permute.xlu1 %1739 }
 0x1dc   : > { %1815 = vst.msk [vmem:[#allocation2 + $0x54] sm:$0xf] %vm1793_vm14, %v1740_v58 }
 0x1dd   : > { %v1738_v2 = vpop.permute.xlu0 %1737  ;;  %1306 = vrot.lane.b32.xlu1 %v4813_v35, %s3031_s26 }
 0x1de   : > { %1814 = vst.msk [vmem:[#allocation2 + $0x50] sm:$0xf] %vm1793_vm14, %v1738_v2  ;;  %v1695_v2 = vrot.slane %v1693_v17, 5 }
 0x1df   : > { %1304 = vrot.lane.b32.xlu0 %v4814_v57, %s3031_s26  ;;  %v1712_v51 = vpop.permute.xlu1 %1711 }
 0x1e0   : > { %1801 = vst.msk [vmem:[#allocation2 + $0x1c] sm:$0xf] %vm1793_vm14, %v1712_v51  ;;  %v1681_v51 = vrot.slane %v1680_v41, 4 }
 0x1e1   : > { %v1710_v15 = vpop.permute.xlu0 %1709  ;;  %1338 = vrot.lane.b32.xlu1 %v4317_v54, %s3031_s26 }
 0x1e2   : > { %1800 = vst.msk [vmem:[#allocation2 + $0x18] sm:$0xf] %vm1793_vm14, %v1710_v15 }
 0x1e3   : > { %1336 = vrot.lane.b32.xlu0 %v4321_v37, %s3031_s26  ;;  %v1744_v27 = vpop.permute.xlu1 %1743 }
 0x1e4   : > { %1817 = vst.msk [vmem:[#allocation2 + $0x5c] sm:$0xf] %vm1793_vm14, %v1744_v27 }
 0x1e5   : > { %v1742_v32 = vpop.permute.xlu0 %1741  ;;  %1439 = vrot.lane.b32.xlu1 %v4811_v14, %s3032_s27 }
 0x1e6   : > { %1816 = vst.msk [vmem:[#allocation2 + $0x58] sm:$0xf] %vm1793_vm14, %v1742_v32 }
 0x1e7   : > { %1437 = vrot.lane.b32.xlu0 %v4812_v38, %s3032_s27  ;;  %v1845_v25 = vpop.permute.xlu1 %1844 }
 0x1e8   : > { %1936 = vst.msk [vmem:[#allocation2 + $0x14] sm:$0xf] %vm1930_vm15, %v1845_v25  ;;  %v1831_v25 = vrot.slane %v1829_v49, 4 }
 0x1e9   : > { %v1843_v59 = vpop.permute.xlu0 %1842  ;;  %1471 = vrot.lane.b32.xlu1 %v3805_v7, %s3032_s27 }
 0x1ea   : > { %1935 = vst.msk [vmem:[#allocation2 + $0x10] sm:$0xf] %vm1930_vm15, %v1843_v59  ;;  %v1832_v59 = vrot.slane %v279_v24, 5 }
 0x1eb   : > { %1469 = vrot.lane.b32.xlu0 %v3809_v26, %s3032_s27  ;;  %v1877_v9 = vpop.permute.xlu1 %1876 }
 0x1ec   : > { %1952 = vst.msk [vmem:[#allocation2 + $0x54] sm:$0xf] %vm1930_vm15, %v1877_v9  ;;  %v1833_v12 = vsel %vm3553_vm6, %v1831_v25, %v1832_v59 }
 0x1ed   : > { %v1875_v11 = vpop.permute.xlu0 %1874  ;;  %1443 = vrot.lane.b32.xlu1 %v4816_v8, %s3032_s27 }
 0x1ee   : > { %1951 = vst.msk [vmem:[#allocation2 + $0x50] sm:$0xf] %vm1930_vm15, %v1875_v11 }
 0x1ef   : > { %1441 = vrot.lane.b32.xlu0 %v4817_v48, %s3032_s27  ;;  %v1849_v26 = vpop.permute.xlu1 %1848 }
 0x1f0   : > { %1938 = vst.msk [vmem:[#allocation2 + $0x1c] sm:$0xf] %vm1930_vm15, %v1849_v26 }
 0x1f1   : > { %v1847_v63 = vpop.permute.xlu0 %1846  ;;  %v2992_v62 = vld [vmem:[#allocation2 + $0x10] sm:$0xff]   ;;  %1475 = vrot.lane.b32.xlu1 %v4351_v0, %s3032_s27 }
 0x1f2   : > { %1937 = vst.msk [vmem:[#allocation2 + $0x18] sm:$0xf] %vm1930_vm15, %v1847_v63  ;;  %2916 = vmatprep.mubr.msk.bf16.mxu0 %vm2095_vm0, %v2992_v62 }
 0x1f3   : > { %1473 = vrot.lane.b32.xlu0 %v4355_v29, %s3032_s27  ;;  %v1881_v18 = vpop.permute.xlu1 %1880 }
 0x1f4   : > { %1954 = vst.msk [vmem:[#allocation2 + $0x5c] sm:$0xf] %vm1930_vm15, %v1881_v18 }
 0x1f5   : > { %v1879_v10 = vpop.permute.xlu0 %1878  ;;  %v2993_v46 = vld [vmem:[#allocation2 + $0x50] sm:$0xff]   ;;  %1570 = vrot.lane.b32.xlu1 %v4819_v61, %s3033_s28 }
 0x1f6   : > { %1953 = vst.msk [vmem:[#allocation2 + $0x58] sm:$0xf] %vm1930_vm15, %v1879_v10  ;;  %2932 = vmatprep.mubr.msk.bf16.mxu1 %vm2095_vm0, %v2993_v46 }
 0x1f7   : > { %1568 = vrot.lane.b32.xlu0 %v4820_v22, %s3033_s28  ;;  %v1295_v33 = vpop.permute.xlu1 %1294 }
 0x1f8   : > { %1382 = vst.msk [vmem:[#allocation2 + $0x24] sm:$0xf] %vm1372_vm11, %v1295_v33 }
 0x1f9   : > { %v1293_v13 = vpop.permute.xlu0 %1292  ;;  %v2994_v20 = vld [vmem:[#allocation2 + $0x18] sm:$0xff]   ;;  %1602 = vrot.lane.b32.xlu1 %v3908_v19, %s3033_s28  ;;  %v1683_v19 = vshll.u32 %v4383_v28, 16 }
 0x1fa   : > { %1381 = vst.msk [vmem:[#allocation2 + $0x20] sm:$0xf] %vm1372_vm11, %v1293_v13  ;;  %2917 = vmatmul.mubr.msk.bf16.gmra.mxu0 %vm2095_vm0, %v2994_v20 }
 0x1fb   : > { %1600 = vrot.lane.b32.xlu0 %v3911_v56, %s3033_s28  ;;  %v1327_v14 = vpop.permute.xlu1 %1326  ;;  %v1687_v56 = vshrl.u32 %v4383_v28, 16  ;;  %v1685_v52 = vrot.slane %v1683_v19, 5 }
 0x1fc   : > { %1398 = vst.msk [vmem:[#allocation2 + $0x64] sm:$0xf] %vm1372_vm11, %v1327_v14 }
 0x1fd   : > { %v1325_v38 = vpop.permute.xlu0 %1324  ;;  %v2995_v6 = vld [vmem:[#allocation2 + $0x58] sm:$0xff]   ;;  %1574 = vrot.lane.b32.xlu1 %v4821_v16, %s3033_s28  ;;  %v1689_v1 = vrot.slane %v1687_v56, 4 }
 0x1fe   : > { %1397 = vst.msk [vmem:[#allocation2 + $0x60] sm:$0xf] %vm1372_vm11, %v1325_v38  ;;  %2933 = vmatmul.mubr.msk.bf16.gmra.mxu1 %vm2095_vm0, %v2995_v6 }
 0x1ff   : > { %1572 = vrot.lane.b32.xlu0 %v4822_v23, %s3033_s28  ;;  %v1299_v34 = vpop.permute.xlu1 %1298  ;;  %v1690_v55 = vor.u32 %v1689_v1, %v1685_v52 }
 0x200   : > { %1384 = vst.msk [vmem:[#allocation2 + $0x2c] sm:$0xf] %vm1372_vm11, %v1299_v34 }
 0x201   : > { %v1297_v45 = vpop.permute.xlu0 %1296  ;;  %1606 = vrot.lane.b32.xlu1 %v4383_v28, %s3033_s28  ;;  %v1691_v43 = vrot.slane %v1690_v55, 4 }
 0x202   : > { %1383 = vst.msk [vmem:[#allocation2 + $0x28] sm:$0xf] %vm1372_vm11, %v1297_v45 }
 0x203   : > { %1604 = vrot.lane.b32.xlu0 %v4391_v21, %s3033_s28  ;;  %v1331_v50 = vpop.permute.xlu1 %1330 }
 0x204   : > { %1400 = vst.msk [vmem:[#allocation2 + $0x6c] sm:$0xf] %vm1372_vm11, %v1331_v50 }
 0x205   : > { %v1329_v5 = vpop.permute.xlu0 %1328  ;;  %1723 = vrot.lane.b32.xlu1 %v4813_v35, %s3034_s29 }
 0x206   : > { %1399 = vst.msk [vmem:[#allocation2 + $0x68] sm:$0xf] %vm1372_vm11, %v1329_v5 }
 0x207   : > { %1721 = vrot.lane.b32.xlu0 %v4814_v57, %s3034_s29  ;;  %v1432_v31 = vpop.permute.xlu1 %1431 }
 0x208   : > { %1519 = vst.msk [vmem:[#allocation2 + $0x24] sm:$0xf] %vm1509_vm12, %v1432_v31 }
 0x209   : > { %v1430_v58 = vpop.permute.xlu0 %1429  ;;  %1755 = vrot.lane.b32.xlu1 %v4317_v54, %s3034_s29  ;;  %v1696_v54 = vsel %vm3134_vm3, %v1691_v43, %v1695_v2 }
 0x20a   : > { %1518 = vst.msk [vmem:[#allocation2 + $0x20] sm:$0xf] %vm1509_vm12, %v1430_v58 }
 0x20b   : > { %1753 = vrot.lane.b32.xlu0 %v4321_v37, %s3034_s29  ;;  %v1464_v35 = vpop.permute.xlu1 %1463  ;;  %v1686_v37 = vsel %vm3134_vm3, %v1681_v51, %v1685_v52  ;;  %v4502_v51 = vld [vmem:[%s4629_s2] ss:$0 sm:$0xff] }
 0x20c   : > { %1535 = vst.msk [vmem:[#allocation2 + $0x64] sm:$0xf] %vm1509_vm12, %v1464_v35 }
 0x20d   : > { %v1462_v57 = vpop.permute.xlu0 %1461  ;;  %1727 = vrot.lane.b32.xlu1 %v4789_v4, %s3034_s29 }
 0x20e   : > { %1534 = vst.msk [vmem:[#allocation2 + $0x60] sm:$0xf] %vm1509_vm12, %v1462_v57 }
 0x20f   : > { %1725 = vrot.lane.b32.xlu0 %v4790_v47, %s3034_s29  ;;  %v1436_v15 = vpop.permute.xlu1 %1435 }
 0x210   : > { %1521 = vst.msk [vmem:[#allocation2 + $0x2c] sm:$0xf] %vm1509_vm12, %v1436_v15 }
 0x211   : > { %v1434_v27 = vpop.permute.xlu0 %1433  ;;  %1759 = vrot.lane.b32.xlu1 %v1696_v54, %s3034_s29 }
 0x212   : > { %1520 = vst.msk [vmem:[#allocation2 + $0x28] sm:$0xf] %vm1509_vm12, %v1434_v27 }
 0x213   : > { %1757 = vrot.lane.b32.xlu0 %v1686_v37, %s3034_s29  ;;  %v1468_v4 = vpop.permute.xlu1 %1467  ;;  %v4509_v37 = vld [vmem:[%s4630_s3] ss:$0 sm:$0xff] }
 0x214   : > { %1537 = vst.msk [vmem:[#allocation2 + $0x6c] sm:$0xf] %vm1509_vm12, %v1468_v4 }
 0x215   : > { %v1466_v47 = vpop.permute.xlu0 %1465  ;;  %1860 = vrot.lane.b32.xlu1 %v4816_v8, %s3035_s10  ;;  %v1830_v8 = vsel %vm3553_vm6, %v2687_v36, %v1829_v49 }
 0x216   : > { %1536 = vst.msk [vmem:[#allocation2 + $0x68] sm:$0xf] %vm1509_vm12, %v1466_v47 }
 0x217   : > { %1858 = vrot.lane.b32.xlu0 %v4817_v48, %s3035_s10  ;;  %v1563_v32 = vpop.permute.xlu1 %1562 }
 0x218   : > { %1650 = vst.msk [vmem:[#allocation2 + $0x24] sm:$0xf] %vm1640_vm13, %v1563_v32 }
 0x219   : > { %v1561_v40 = vpop.permute.xlu0 %1560  ;;  %1892 = vrot.lane.b32.xlu1 %v4351_v0, %s3035_s10 }
 0x21a   : > { %1649 = vst.msk [vmem:[#allocation2 + $0x20] sm:$0xf] %vm1640_vm13, %v1561_v40 }
 0x21b   : > { %1890 = vrot.lane.b32.xlu0 %v4355_v29, %s3035_s10  ;;  %v1595_v42 = vpop.permute.xlu1 %1594 }
 0x21c   : > { %1666 = vst.msk [vmem:[#allocation2 + $0x64] sm:$0xf] %vm1640_vm13, %v1595_v42 }
 0x21d   : > { %v1593_v9 = vpop.permute.xlu0 %1592  ;;  %1864 = vrot.lane.b32.xlu1 %v3712_v3, %s3035_s10 }
 0x21e   : > { %1665 = vst.msk [vmem:[#allocation2 + $0x60] sm:$0xf] %vm1640_vm13, %v1593_v9 }
 0x21f   : > { %1862 = vrot.lane.b32.xlu0 %v3718_v39, %s3035_s10  ;;  %v1567_v11 = vpop.permute.xlu1 %1566 }
 0x220   : > { %1652 = vst.msk [vmem:[#allocation2 + $0x2c] sm:$0xf] %vm1640_vm13, %v1567_v11 }
 0x221   : > { %v1565_v48 = vpop.permute.xlu0 %1564  ;;  %1896 = vrot.lane.b32.xlu1 %v1833_v12, %s3035_s10 }
 0x222   : > { %1651 = vst.msk [vmem:[#allocation2 + $0x28] sm:$0xf] %vm1640_vm13, %v1565_v48 }
 0x223   : > { %1894 = vrot.lane.b32.xlu0 %v1830_v8, %s3035_s10  ;;  %v1599_v3 = vpop.permute.xlu1 %1598 }
 0x224   : > { %1668 = vst.msk [vmem:[#allocation2 + $0x6c] sm:$0xf] %vm1640_vm13, %v1599_v3 }
 0x225   : > { %v1597_v39 = vpop.permute.xlu0 %1596 }
 0x226   : > { %1667 = vst.msk [vmem:[#allocation2 + $0x68] sm:$0xf] %vm1640_vm13, %v1597_v39 }
 0x227   : > { %v1716_v0 = vpop.permute.xlu1 %1715 }
 0x228   : > { %1803 = vst.msk [vmem:[#allocation2 + $0x24] sm:$0xf] %vm1793_vm14, %v1716_v0 }
 0x229   : > { %v1714_v7 = vpop.permute.xlu0 %1713 }
 0x22a   : > { %1802 = vst.msk [vmem:[#allocation2 + $0x20] sm:$0xf] %vm1793_vm14, %v1714_v7 }
 0x22b   : > { %v1748_v26 = vpop.permute.xlu1 %1747 }
 0x22c   : > { %1819 = vst.msk [vmem:[#allocation2 + $0x64] sm:$0xf] %vm1793_vm14, %v1748_v26 }
 0x22d   : > { %v1746_v29 = vpop.permute.xlu0 %1745 }
 0x22e   : > { %1818 = vst.msk [vmem:[#allocation2 + $0x60] sm:$0xf] %vm1793_vm14, %v1746_v29 }
 0x22f   : > { %v1720_v63 = vpop.permute.xlu1 %1719 }
 0x230   : > { %1805 = vst.msk [vmem:[#allocation2 + $0x2c] sm:$0xf] %vm1793_vm14, %v1720_v63 }
 0x231   : > { %v1718_v62 = vpop.permute.xlu0 %1717 }
 0x232   : > { %1804 = vst.msk [vmem:[#allocation2 + $0x28] sm:$0xf] %vm1793_vm14, %v1718_v62 }
 0x233   : > { %v1752_v18 = vpop.permute.xlu1 %1751 }
 0x234   : > { %1821 = vst.msk [vmem:[#allocation2 + $0x6c] sm:$0xf] %vm1793_vm14, %v1752_v18 }
 0x235   : > { %v1750_v10 = vpop.permute.xlu0 %1749 }
 0x236   : > { %1820 = vst.msk [vmem:[#allocation2 + $0x68] sm:$0xf] %vm1793_vm14, %v1750_v10 }
 0x237   : > { %v1853_v46 = vpop.permute.xlu1 %1852 }
 0x238   : > { %1940 = vst.msk [vmem:[#allocation2 + $0x24] sm:$0xf] %vm1930_vm15, %v1853_v46 }
 0x239   : > { %v1851_v61 = vpop.permute.xlu0 %1850 }
 0x23a   : > { %1939 = vst.msk [vmem:[#allocation2 + $0x20] sm:$0xf] %vm1930_vm15, %v1851_v61 }
 0x23b   : > { %v1885_v22 = vpop.permute.xlu1 %1884 }
 0x23c   : > { %1956 = vst.msk [vmem:[#allocation2 + $0x64] sm:$0xf] %vm1930_vm15, %v1885_v22 }
 0x23d   : > { %v1883_v33 = vpop.permute.xlu0 %1882 }
 0x23e   : > { %1955 = vst.msk [vmem:[#allocation2 + $0x60] sm:$0xf] %vm1930_vm15, %v1883_v33 }
 0x23f   : > { %v1857_v13 = vpop.permute.xlu1 %1856 }
 0x240   : > { %1942 = vst.msk [vmem:[#allocation2 + $0x2c] sm:$0xf] %vm1930_vm15, %v1857_v13 }
 0x241   : > { %v1855_v20 = vpop.permute.xlu0 %1854  ;;  %v2996_v14 = vld [vmem:[#allocation2 + $0x20] sm:$0xff]  }
 0x242   : > { %1941 = vst.msk [vmem:[#allocation2 + $0x28] sm:$0xf] %vm1930_vm15, %v1855_v20  ;;  %2920 = vmatprep.mubr.msk.bf16.mxu0 %vm2095_vm0, %v2996_v14 }
 0x243   : > { %v1889_v38 = vpop.permute.xlu1 %1888 }
 0x244   : > { %1958 = vst.msk [vmem:[#allocation2 + $0x6c] sm:$0xf] %vm1930_vm15, %v1889_v38 }
 0x245   : > { %v1887_v6 = vpop.permute.xlu0 %1886  ;;  %v2997_v16 = vld [vmem:[#allocation2 + $0x60] sm:$0xff]  }
 0x246   : > { %1957 = vst.msk [vmem:[#allocation2 + $0x68] sm:$0xf] %vm1930_vm15, %v1887_v6  ;;  %2936 = vmatprep.mubr.msk.bf16.mxu1 %vm2095_vm0, %v2997_v16 }
 0x247   : > { %v1303_v28 = vpop.permute.xlu1 %1302 }
 0x248   : > { %1386 = vst.msk [vmem:[#allocation2 + $0x34] sm:$0xf] %vm1372_vm11, %v1303_v28 }
 0x249   : > { %v1301_v23 = vpop.permute.xlu0 %1300  ;;  %v2998_v19 = vld [vmem:[#allocation2 + $0x28] sm:$0xff]  }
 0x24a   : > { %1385 = vst.msk [vmem:[#allocation2 + $0x30] sm:$0xf] %vm1372_vm11, %v1301_v23  ;;  %2921 = vmatmul.mubr.msk.bf16.gmra.mxu0 %vm2095_vm0, %v2998_v19 }
 0x24b   : > { %v1335_v56 = vpop.permute.xlu1 %1334 }
 0x24c   : > { %1402 = vst.msk [vmem:[#allocation2 + $0x74] sm:$0xf] %vm1372_vm11, %v1335_v56 }
 0x24d   : > { %v1333_v21 = vpop.permute.xlu0 %1332  ;;  %v2999_v34 = vld [vmem:[#allocation2 + $0x68] sm:$0xff]  }
 0x24e   : > { %1401 = vst.msk [vmem:[#allocation2 + $0x70] sm:$0xf] %vm1372_vm11, %v1333_v21  ;;  %2937 = vmatmul.mubr.msk.bf16.gmra.mxu1 %vm2095_vm0, %v2999_v34 }
 0x24f   : > { %v1307_v44 = vpop.permute.xlu1 %1306 }
 0x250   : > { %1388 = vst.msk [vmem:[#allocation2 + $0x3c] sm:$0xf] %vm1372_vm11, %v1307_v44 }
 0x251   : > { %v1305_v53 = vpop.permute.xlu0 %1304 }
 0x252   : > { %1387 = vst.msk [vmem:[#allocation2 + $0x38] sm:$0xf] %vm1372_vm11, %v1305_v53 }
 0x253   : > { %v1339_v45 = vpop.permute.xlu1 %1338 }
 0x254   : > { %1404 = vst.msk [vmem:[#allocation2 + $0x7c] sm:$0xf] %vm1372_vm11, %v1339_v45 }
 0x255   : > { %v1337_v52 = vpop.permute.xlu0 %1336 }
 0x256   : > { %1403 = vst.msk [vmem:[#allocation2 + $0x78] sm:$0xf] %vm1372_vm11, %v1337_v52 }
 0x257   : > { %v1440_v1 = vpop.permute.xlu1 %1439 }
 0x258   : > { %1523 = vst.msk [vmem:[#allocation2 + $0x34] sm:$0xf] %vm1509_vm12, %v1440_v1 }
 0x259   : > { %v1438_v30 = vpop.permute.xlu0 %1437 }
 0x25a   : > { %1522 = vst.msk [vmem:[#allocation2 + $0x30] sm:$0xf] %vm1509_vm12, %v1438_v30 }
 0x25b   : > { %v1472_v60 = vpop.permute.xlu1 %1471 }
 0x25c   : > { %1539 = vst.msk [vmem:[#allocation2 + $0x74] sm:$0xf] %vm1509_vm12, %v1472_v60 }
 0x25d   : > { %v1470_v50 = vpop.permute.xlu0 %1469 }
 0x25e   : > { %1538 = vst.msk [vmem:[#allocation2 + $0x70] sm:$0xf] %vm1509_vm12, %v1470_v50 }
 0x25f   : > { %v1444_v24 = vpop.permute.xlu1 %1443 }
 0x260   : > { %1525 = vst.msk [vmem:[#allocation2 + $0x3c] sm:$0xf] %vm1509_vm12, %v1444_v24 }
 0x261   : > { %v1442_v5 = vpop.permute.xlu0 %1441 }
 0x262   : > { %1524 = vst.msk [vmem:[#allocation2 + $0x38] sm:$0xf] %vm1509_vm12, %v1442_v5 }
 0x263   : > { %v1476_v55 = vpop.permute.xlu1 %1475 }
 0x264   : > { %1541 = vst.msk [vmem:[#allocation2 + $0x7c] sm:$0xf] %vm1509_vm12, %v1476_v55 }
 0x265   : > { %v1474_v17 = vpop.permute.xlu0 %1473 }
 0x266   : > { %1540 = vst.msk [vmem:[#allocation2 + $0x78] sm:$0xf] %vm1509_vm12, %v1474_v17 }
 0x267   : > { %v1571_v31 = vpop.permute.xlu1 %1570 }
 0x268   : > { %1654 = vst.msk [vmem:[#allocation2 + $0x34] sm:$0xf] %vm1640_vm13, %v1571_v31 }
 0x269   : > { %v1569_v41 = vpop.permute.xlu0 %1568 }
 0x26a   : > { %1653 = vst.msk [vmem:[#allocation2 + $0x30] sm:$0xf] %vm1640_vm13, %v1569_v41 }
 0x26b   : > { %v1603_v58 = vpop.permute.xlu1 %1602 }
 0x26c   : > { %1670 = vst.msk [vmem:[#allocation2 + $0x74] sm:$0xf] %vm1640_vm13, %v1603_v58 }
 0x26d   : > { %v1601_v43 = vpop.permute.xlu0 %1600 }
 0x26e   : > { %1669 = vst.msk [vmem:[#allocation2 + $0x70] sm:$0xf] %vm1640_vm13, %v1601_v43 }
 0x26f   : > { %v1575_v2 = vpop.permute.xlu1 %1574 }
 0x270   : > { %1656 = vst.msk [vmem:[#allocation2 + $0x3c] sm:$0xf] %vm1640_vm13, %v1575_v2 }
 0x271   : > { %v1573_v35 = vpop.permute.xlu0 %1572 }
 0x272   : > { %1655 = vst.msk [vmem:[#allocation2 + $0x38] sm:$0xf] %vm1640_vm13, %v1573_v35  ;;  %v2914_v57 = vpop.f32.mrf.mxu0 }
 0x273   : > { %v2318_v54 = vmul.f32 %v2914_v57, %v4502_v51  ;;  %v1607_v15 = vpop.permute.xlu1 %1606 }
 0x274   : > { %1672 = vst.msk [vmem:[#allocation2 + $0x7c] sm:$0xf] %vm1640_vm13, %v1607_v15  ;;  %v2182_v4 = vpop.f32.mrf.mxu0 }
 0x275   : > { %v1605_v27 = vpop.permute.xlu0 %1604  ;;  %v2316_v47 = vmul.f32 %v4502_v51, %v2182_v4  ;;  %v2357_v40 = vadd.f32 %v4509_v37, %v2318_v54 }
 0x276   : > { %1671 = vst.msk [vmem:[#allocation2 + $0x78] sm:$0xf] %vm1640_vm13, %v1605_v27  ;;  %v2915_v49 = vpop.f32.mrf.mxu0  ;;  %v2930_v32 = vpop.f32.mrf.mxu1 }
 0x277   : > { %v2319_v25 = vmul.f32 %v2915_v49, %v4502_v51  ;;  %v1724_v59 = vpop.permute.xlu1 %1723  ;;  %v2334_v36 = vmul.f32 %v2930_v32, %v4502_v51  ;;  %v2355_v12 = vadd.f32 %v4509_v37, %v2316_v47  ;;  %v2389_v39 = vmax.f32 %v2357_v40, 0.0 }
 0x278   : > { %1807 = vst.msk [vmem:[#allocation2 + $0x34] sm:$0xf] %vm1793_vm14, %v1724_v59  ;;  %v2185_v9 = vpop.f32.mrf.mxu0  ;;  %v2246_v48 = vpop.f32.mrf.mxu1 }
 0x279   : > { %v1722_v42 = vpop.permute.xlu0 %1721  ;;  %v2358_v11 = vadd.f32 %v4509_v37, %v2319_v25  ;;  %v2317_v8 = vmul.f32 %v4502_v51, %v2185_v9  ;;  %v2332_v3 = vmul.f32 %v4502_v51, %v2246_v48  ;;  %v2373_v63 = vadd.f32 %v4509_v37, %v2334_v36 }
 0x27a   : > { %1806 = vst.msk [vmem:[#allocation2 + $0x30] sm:$0xf] %vm1793_vm14, %v1722_v42  ;;  %v2931_v26 = vpop.f32.mrf.mxu1  ;;  %v2387_v10 = vmax.f32 %v2355_v12, 0.0 }
 0x27b   : > { %v2390_v0 = vmax.f32 %v2358_v11, 0.0  ;;  %v2356_v7 = vadd.f32 %v4509_v37, %v2317_v8  ;;  %v1756_v29 = vpop.permute.xlu1 %1755  ;;  %v2335_v62 = vmul.f32 %v2931_v26, %v4502_v51  ;;  %v2371_v33 = vadd.f32 %v4509_v37, %v2332_v3 }
 0x27c   : > { %1823 = vst.msk [vmem:[#allocation2 + $0x74] sm:$0xf] %vm1793_vm14, %v1756_v29  ;;  %v2249_v22 = vpop.f32.mrf.mxu1  ;;  %v2405_v6 = vmax.f32 %v2373_v63, 0.0 }
 0x27d   : > { %v1754_v18 = vpop.permute.xlu0 %1753  ;;  %v2800_v46 = vpack.c.bf16 %v2390_v0, %v2389_v39  ;;  %v2388_v61 = vmax.f32 %v2356_v7, 0.0  ;;  %v2374_v13 = vadd.f32 %v4509_v37, %v2335_v62  ;;  %v2333_v20 = vmul.f32 %v4502_v51, %v2249_v22 }
 0x27e   : > { %1822 = vst.msk [vmem:[#allocation2 + $0x70] sm:$0xf] %vm1793_vm14, %v1754_v18  ;;  %v2403_v19 = vmax.f32 %v2371_v33, 0.0 }
 0x27f   : > { %2872 = vst [vmem:[%s4528_s22 + $0x8] sm:$0xff] %v2800_v46   ;;  %v2795_v14 = vpack.c.bf16 %v2388_v61, %v2387_v10  ;;  %v1728_v38 = vpop.permute.xlu1 %1727  ;;  %v2406_v16 = vmax.f32 %v2374_v13, 0.0  ;;  %v2372_v28 = vadd.f32 %v4509_v37, %v2333_v20 }
 0x280   : > { %1809 = vst.msk [vmem:[#allocation2 + $0x3c] sm:$0xf] %vm1793_vm14, %v1728_v38 }
 0x281   : > { %v1726_v23 = vpop.permute.xlu0 %1725  ;;  %2796 = vst [vmem:[%s4528_s22] sm:$0xff] %v2795_v14   ;;  %v2840_v56 = vpack.c.bf16 %v2406_v16, %v2405_v6  ;;  %v2404_v21 = vmax.f32 %v2372_v28, 0.0 }
 0x282   : > { %1808 = vst.msk [vmem:[#allocation2 + $0x38] sm:$0xf] %vm1793_vm14, %v1726_v23 }
 0x283   : > { %v1760_v34 = vpop.permute.xlu1 %1759  ;;  %2880 = vst [vmem:[%s4528_s22 + $0x48] sm:$0xff] %v2840_v56   ;;  %v2835_v44 = vpack.c.bf16 %v2404_v21, %v2403_v19 }
 0x284   : > { %1825 = vst.msk [vmem:[#allocation2 + $0x7c] sm:$0xf] %vm1793_vm14, %v1760_v34 }
 0x285   : > { %v1758_v53 = vpop.permute.xlu0 %1757  ;;  %2879 = vst [vmem:[%s4528_s22 + $0x40] sm:$0xff] %v2835_v44  }
 0x286   : > { %1824 = vst.msk [vmem:[#allocation2 + $0x78] sm:$0xf] %vm1793_vm14, %v1758_v53 }
 0x287   : > { %v1861_v45 = vpop.permute.xlu1 %1860 }
 0x288   : > { %1944 = vst.msk [vmem:[#allocation2 + $0x34] sm:$0xf] %vm1930_vm15, %v1861_v45 }
 0x289   : > { %v1859_v52 = vpop.permute.xlu0 %1858 }
 0x28a   : > { %1943 = vst.msk [vmem:[#allocation2 + $0x30] sm:$0xf] %vm1930_vm15, %v1859_v52 }
 0x28b   : > { %v1893_v1 = vpop.permute.xlu1 %1892 }
 0x28c   : > { %1960 = vst.msk [vmem:[#allocation2 + $0x74] sm:$0xf] %vm1930_vm15, %v1893_v1 }
 0x28d   : > { %v1891_v30 = vpop.permute.xlu0 %1890 }
 0x28e   : > { %1959 = vst.msk [vmem:[#allocation2 + $0x70] sm:$0xf] %vm1930_vm15, %v1891_v30 }
 0x28f   : > { %v1865_v60 = vpop.permute.xlu1 %1864 }
 0x290   : > { %1946 = vst.msk [vmem:[#allocation2 + $0x3c] sm:$0xf] %vm1930_vm15, %v1865_v60 }
 0x291   : > { %v1863_v50 = vpop.permute.xlu0 %1862  ;;  %v3000_v24 = vld [vmem:[#allocation2 + $0x30] sm:$0xff]  }
 0x292   : > { %1945 = vst.msk [vmem:[#allocation2 + $0x38] sm:$0xf] %vm1930_vm15, %v1863_v50  ;;  %2924 = vmatprep.mubr.msk.bf16.mxu0 %vm2095_vm0, %v3000_v24 }
 0x293   : > { %v1897_v5 = vpop.permute.xlu1 %1896 }
 0x294   : > { %1962 = vst.msk [vmem:[#allocation2 + $0x7c] sm:$0xf] %vm1930_vm15, %v1897_v5 }
 0x295   : > { %v1895_v55 = vpop.permute.xlu0 %1894  ;;  %v3001_v17 = vld [vmem:[#allocation2 + $0x70] sm:$0xff]  }
 0x296   : > { %1961 = vst.msk [vmem:[#allocation2 + $0x78] sm:$0xf] %vm1930_vm15, %v1895_v55  ;;  %2940 = vmatprep.mubr.msk.bf16.mxu1 %vm2095_vm0, %v3001_v17 }
 0x299   : > { %v3002_v31 = vld [vmem:[#allocation2 + $0x38] sm:$0xff]  }
 0x29a   : > { %2925 = vmatmul.mubr.msk.bf16.gmra.mxu0 %vm2095_vm0, %v3002_v31 }
 0x29d   : > { %v3003_v41 = vld [vmem:[#allocation2 + $0x78] sm:$0xff]  }
 0x29e   : > { %2941 = vmatmul.mubr.msk.bf16.gmra.mxu1 %vm2095_vm0, %v3003_v41 }
 0x2ba   : > { %v2918_v58 = vpop.f32.mrf.mxu0 }
 0x2bb   : > { %v2322_v43 = vmul.f32 %v2918_v58, %v4502_v51 }
 0x2bc   : > { %v2198_v2 = vpop.f32.mrf.mxu0 }
 0x2bd   : > { %v2320_v35 = vmul.f32 %v4502_v51, %v2198_v2  ;;  %v2361_v57 = vadd.f32 %v4509_v37, %v2322_v43 }
 0x2be   : > { %v2919_v54 = vpop.f32.mrf.mxu0  ;;  %v2934_v15 = vpop.f32.mrf.mxu1 }
 0x2bf   : > { %v2323_v27 = vmul.f32 %v2919_v54, %v4502_v51  ;;  %v2338_v4 = vmul.f32 %v2934_v15, %v4502_v51  ;;  %v2359_v47 = vadd.f32 %v4509_v37, %v2320_v35  ;;  %v2393_v59 = vmax.f32 %v2361_v57, 0.0 }
 0x2c0   : > { %v2201_v49 = vpop.f32.mrf.mxu0  ;;  %v2262_v32 = vpop.f32.mrf.mxu1 }
 0x2c1   : > { %v2362_v40 = vadd.f32 %v4509_v37, %v2323_v27  ;;  %v2321_v25 = vmul.f32 %v4502_v51, %v2201_v49  ;;  %v2336_v36 = vmul.f32 %v4502_v51, %v2262_v32  ;;  %v2377_v12 = vadd.f32 %v4509_v37, %v2338_v4 }
 0x2c2   : > { %v2935_v42 = vpop.f32.mrf.mxu1  ;;  %v2391_v48 = vmax.f32 %v2359_v47, 0.0 }
 0x2c3   : > { %v2394_v9 = vmax.f32 %v2362_v40, 0.0  ;;  %v2360_v11 = vadd.f32 %v4509_v37, %v2321_v25  ;;  %v2339_v8 = vmul.f32 %v2935_v42, %v4502_v51  ;;  %v2375_v3 = vadd.f32 %v4509_v37, %v2336_v36 }
 0x2c4   : > { %v2265_v39 = vpop.f32.mrf.mxu1  ;;  %v2409_v63 = vmax.f32 %v2377_v12, 0.0 }
 0x2c5   : > { %v2810_v0 = vpack.c.bf16 %v2394_v9, %v2393_v59  ;;  %v2392_v7 = vmax.f32 %v2360_v11, 0.0  ;;  %v2378_v26 = vadd.f32 %v4509_v37, %v2339_v8  ;;  %v2337_v29 = vmul.f32 %v4502_v51, %v2265_v39 }
 0x2c6   : > { %v2407_v46 = vmax.f32 %v2375_v3, 0.0 }
 0x2c7   : > { %2874 = vst [vmem:[%s4528_s22 + $0x18] sm:$0xff] %v2810_v0   ;;  %v2805_v62 = vpack.c.bf16 %v2392_v7, %v2391_v48  ;;  %v2410_v18 = vmax.f32 %v2378_v26, 0.0  ;;  %v2376_v10 = vadd.f32 %v4509_v37, %v2337_v29 }
 0x2c9   : > { %2873 = vst [vmem:[%s4528_s22 + $0x10] sm:$0xff] %v2805_v62   ;;  %v2850_v61 = vpack.c.bf16 %v2410_v18, %v2409_v63  ;;  %v2408_v22 = vmax.f32 %v2376_v10, 0.0 }
 0x2cb   : > { %2882 = vst [vmem:[%s4528_s22 + $0x58] sm:$0xff] %v2850_v61   ;;  %v2845_v33 = vpack.c.bf16 %v2408_v22, %v2407_v46 }
 0x2cd   : > { %2881 = vst [vmem:[%s4528_s22 + $0x50] sm:$0xff] %v2845_v33  }
 0x30a   : > { %v2922_v13 = vpop.f32.mrf.mxu0 }
 0x30b   : > { %v2326_v20 = vmul.f32 %v2922_v13, %v4502_v51 }
 0x30c   : > { %v2214_v14 = vpop.f32.mrf.mxu0 }
 0x30d   : > { %v2324_v38 = vmul.f32 %v4502_v51, %v2214_v14  ;;  %v2365_v6 = vadd.f32 %v4509_v37, %v2326_v20 }
 0x30e   : > { %v2923_v16 = vpop.f32.mrf.mxu0  ;;  %v2938_v28 = vpop.f32.mrf.mxu1 }
 0x30f   : > { %v2327_v23 = vmul.f32 %v2923_v16, %v4502_v51  ;;  %v2342_v19 = vmul.f32 %v2938_v28, %v4502_v51  ;;  %v2363_v56 = vadd.f32 %v4509_v37, %v2324_v38  ;;  %v2397_v45 = vmax.f32 %v2365_v6, 0.0 }
 0x310   : > { %v2217_v21 = vpop.f32.mrf.mxu0  ;;  %v2278_v34 = vpop.f32.mrf.mxu1 }
 0x311   : > { %v2366_v44 = vadd.f32 %v4509_v37, %v2327_v23  ;;  %v2325_v53 = vmul.f32 %v4502_v51, %v2217_v21  ;;  %v2340_v52 = vmul.f32 %v4502_v51, %v2278_v34  ;;  %v2381_v60 = vadd.f32 %v4509_v37, %v2342_v19 }
 0x312   : > { %v2939_v1 = vpop.f32.mrf.mxu1  ;;  %v2395_v5 = vmax.f32 %v2363_v56, 0.0 }
 0x313   : > { %v2398_v30 = vmax.f32 %v2366_v44, 0.0  ;;  %v2364_v50 = vadd.f32 %v4509_v37, %v2325_v53  ;;  %v2343_v24 = vmul.f32 %v2939_v1, %v4502_v51  ;;  %v2379_v55 = vadd.f32 %v4509_v37, %v2340_v52 }
 0x314   : > { %v2281_v17 = vpop.f32.mrf.mxu1  ;;  %v2413_v2 = vmax.f32 %v2381_v60, 0.0 }
 0x315   : > { %v2820_v31 = vpack.c.bf16 %v2398_v30, %v2397_v45  ;;  %v2396_v41 = vmax.f32 %v2364_v50, 0.0  ;;  %v2382_v58 = vadd.f32 %v4509_v37, %v2343_v24  ;;  %v2341_v43 = vmul.f32 %v4502_v51, %v2281_v17 }
 0x316   : > { %v2411_v15 = vmax.f32 %v2379_v55, 0.0 }
 0x317   : > { %2876 = vst [vmem:[%s4528_s22 + $0x28] sm:$0xff] %v2820_v31   ;;  %v2815_v35 = vpack.c.bf16 %v2396_v41, %v2395_v5  ;;  %v2414_v57 = vmax.f32 %v2382_v58, 0.0  ;;  %v2380_v54 = vadd.f32 %v4509_v37, %v2341_v43 }
 0x319   : > { %2875 = vst [vmem:[%s4528_s22 + $0x20] sm:$0xff] %v2815_v35   ;;  %v2860_v27 = vpack.c.bf16 %v2414_v57, %v2413_v2  ;;  %v2412_v4 = vmax.f32 %v2380_v54, 0.0 }
 0x31b   : > { %2884 = vst [vmem:[%s4528_s22 + $0x68] sm:$0xff] %v2860_v27   ;;  %v2855_v47 = vpack.c.bf16 %v2412_v4, %v2411_v15 }
 0x31d   : > { %2883 = vst [vmem:[%s4528_s22 + $0x60] sm:$0xff] %v2855_v47  }
 0x35a   : > { %v2926_v49 = vpop.f32.mrf.mxu0 }
 0x35b   : > { %v2330_v32 = vmul.f32 %v2926_v49, %v4502_v51 }
 0x35c   : > { %v2230_v40 = vpop.f32.mrf.mxu0 }
 0x35d   : > { %v2328_v25 = vmul.f32 %v4502_v51, %v2230_v40  ;;  %v2369_v59 = vadd.f32 %v4509_v37, %v2330_v32 }
 0x35e   : > { %v2927_v36 = vpop.f32.mrf.mxu0  ;;  %v2942_v42 = vpop.f32.mrf.mxu1 }
 0x35f   : > { %v2331_v9 = vmul.f32 %v2927_v36, %v4502_v51  ;;  %v2346_v12 = vmul.f32 %v2942_v42, %v4502_v51  ;;  %v2367_v11 = vadd.f32 %v4509_v37, %v2328_v25  ;;  %v2401_v0 = vmax.f32 %v2369_v59, 0.0 }
 0x360   : > { %v2233_v8 = vpop.f32.mrf.mxu0  ;;  %v2294_v48 = vpop.f32.mrf.mxu1 }
 0x361   : > { %v2370_v3 = vadd.f32 %v4509_v37, %v2331_v9  ;;  %v2329_v39 = vmul.f32 %v4502_v51, %v2233_v8  ;;  %v2344_v7 = vmul.f32 %v4502_v51, %v2294_v48  ;;  %v2385_v63 = vadd.f32 %v4509_v37, %v2346_v12 }
 0x362   : > { %v2943_v26 = vpop.f32.mrf.mxu1  ;;  %v2399_v10 = vmax.f32 %v2367_v11, 0.0 }
 0x363   : > { %v2402_v29 = vmax.f32 %v2370_v3, 0.0  ;;  %v2368_v62 = vadd.f32 %v4509_v37, %v2329_v39  ;;  %v2347_v18 = vmul.f32 %v2943_v26, %v4502_v51  ;;  %v2383_v46 = vadd.f32 %v4509_v37, %v2344_v7 }
 0x364   : > { %v2297_v61 = vpop.f32.mrf.mxu1  ;;  %v2417_v14 = vmax.f32 %v2385_v63, 0.0 }
 0x365   : > { %v2830_v22 = vpack.c.bf16 %v2402_v29, %v2401_v0  ;;  %v2400_v33 = vmax.f32 %v2368_v62, 0.0  ;;  %v2386_v13 = vadd.f32 %v4509_v37, %v2347_v18  ;;  %v2345_v20 = vmul.f32 %v4502_v51, %v2297_v61 }
 0x366   : > { %v2415_v28 = vmax.f32 %v2383_v46, 0.0 }
 0x367   : > { %2878 = vst [vmem:[%s4528_s22 + $0x38] sm:$0xff] %v2830_v22   ;;  %v2825_v38 = vpack.c.bf16 %v2400_v33, %v2399_v10  ;;  %v2418_v6 = vmax.f32 %v2386_v13, 0.0  ;;  %v2384_v16 = vadd.f32 %v4509_v37, %v2345_v20 }
 0x369   : > { %2877 = vst [vmem:[%s4528_s22 + $0x30] sm:$0xff] %v2825_v38   ;;  %v2870_v23 = vpack.c.bf16 %v2418_v6, %v2417_v14  ;;  %v2416_v19 = vmax.f32 %v2384_v16, 0.0 }
 0x36b   : > { %2886 = vst [vmem:[%s4528_s22 + $0x78] sm:$0xff] %v2870_v23   ;;  %v2865_v56 = vpack.c.bf16 %v2416_v19, %v2415_v28 }
 0x36d   : > { %2885 = vst [vmem:[%s4528_s22 + $0x70] sm:$0xff] %v2865_v56  }
 0x36e PF: > { %s14_s17 = sadd.s32 1, %s3026_s17   ;;  %s4823_s15 = smov %s3022_s16 }
 0x36f   : > { %p11_p5 = scmp.ge.s32.totalorder %s14_s17, 4   ;;  %s4824_s16 = smov %s4826_s18 }
 0x371   :  { %13 = sbr.rel (!%p11_p5) target bundleno = 2 (0x2), region = 67 }

</bundles_post_ra>
